<compile_context>
chip_gen: v5e
topology: v5e:2x2
jax: 0.10.0
libtpu: 0.0.40
codegen_flags: <defaults>
</compile_context>

<pallas_src>
import functools

import jax
import jax.numpy as jnp
from jax.experimental import pallas as pl
from jax.experimental.pallas import tpu as pltpu


LN_EPS = 1e-5  # PyTorch nn.LayerNorm default


# ----------------------------- in-kernel math ------------------------------

def _gelu_tanh(x):
    # tanh-approximate GELU (tanh lowers to the EUP slot, freeing VALU slots).
    # PyTorch nn.GELU() default is exact erf GELU; the ~1e-3 max deviation is
    # below the bf16 weight quantization used here. Cubic factored as
    # x * (1 + 0.044715*x*x) to drop one vmul per element.
    c = 0.7978845608028654  # sqrt(2/pi)
    inner = c * x * (1.0 + 0.044715 * (x * x))
    return 0.5 * x * (1.0 + jnp.tanh(inner))


def _residual_ln(x_f32, h_bf16, wu_ref, bu_ref, g_ref, beta_ref):
    """proj_up + residual + LayerNorm. Returns (TB, D) bf16 normalized features."""
    o = jnp.dot(h_bf16, wu_ref[...], preferred_element_type=jnp.float32)
    o = o + bu_ref[...] + x_f32
    # One-pass LayerNorm statistics: var = E[o^2] - mean^2 (f32, post-residual
    # magnitudes are O(1-10) so cancellation is benign). Biased variance,
    # eps=1e-5, matching the PyTorch default.
    mean = jnp.mean(o, axis=-1, keepdims=True)
    mean_sq = jnp.mean(o * o, axis=-1, keepdims=True)
    var = mean_sq - mean * mean
    y = (o - mean) * jax.lax.rsqrt(var + LN_EPS)
    y = y * g_ref[...] + beta_ref[...]
    return y.astype(jnp.bfloat16)


# ------------------------------- the kernel --------------------------------

def _fused_heads_kernel(x_ref,
                        wd_ref, bd_ref,
                        wur_ref, bur_ref, gr_ref, br_ref,
                        wuc_ref, buc_ref, gc_ref, bc_ref,
                        wo_ref, bo_ref,
                        out_ref, *, hidden_dim):
    """Both heads fused.

    x_ref:   (TB, D)   bf16 sentence-embedding batch tile
    wd_ref:  (D, 2H)   bf16, concat of both heads' proj_down weights
    bd_ref:  (1, 2H)   f32,  concat of both heads' proj_down biases
    per head: wu (H, D) bf16, bu (1, D) f32, gamma/beta (1, D) f32
    wo_ref:  (2D, 2)   bf16, block-diagonal concat of both heads' final Linear
    bo_ref:  (1, 2)    f32
    out_ref: (TB, 2)   col 0 = sigmoid(regression), col 1 = classification logit
    """
    x_bf = x_ref[...]                                           # (TB, D) bf16
    x = x_bf.astype(jnp.float32)                                # residual path

    # Fused proj_down for BOTH heads: one (TB, D) @ (D, 2H) MXU matmul.
    h = jnp.dot(x_bf, wd_ref[...],
                preferred_element_type=jnp.float32) + bd_ref[...]
    h = _gelu_tanh(h)                                           # (TB, 2H) f32
    hb = h.astype(jnp.bfloat16)

    y_r = _residual_ln(x, hb[:, :hidden_dim], wur_ref, bur_ref, gr_ref, br_ref)
    y_c = _residual_ln(x, hb[:, hidden_dim:], wuc_ref, buc_ref, gc_ref, bc_ref)

    # Both Linear(D, 1) heads as ONE MXU matmul against a block-diagonal
    # (2D, 2) weight; lane-adjacent concat of two D-multiple-of-128 tiles is
    # register placement, not a relayout.
    y_cat = jnp.concatenate([y_r, y_c], axis=-1)                # (TB, 2D) bf16
    logits = jnp.dot(y_cat, wo_ref[...],
                     preferred_element_type=jnp.float32) + bo_ref[...]  # (TB, 2)

    out_ref[:, 0:1] = jax.nn.sigmoid(logits[:, 0:1]).astype(out_ref.dtype)
    out_ref[:, 1:2] = logits[:, 1:2].astype(out_ref.dtype)


# ------------------------------ host wrapper --------------------------------

def _choose_batch_tile(batch):
    """Cap TB at 256 (VMEM-safe at real dims on v7x); keep >= 2 grid steps when
    B >= 16 so the 'parallel' batch axis can shard across v7x's two cores."""
    max_tb = 256
    if batch >= 16:
        max_tb = min(max_tb, batch // 2)
    for tb in (256, 128, 64, 32, 16, 8):
        if tb <= max_tb and batch % tb == 0:
            return tb
    return batch  # small / odd batch -> one full block


def _pick_vmem_limit_bytes():
    """Generation-aware VMEM limit: v7x has only 64 MiB physical per TensorCore,
    so leave headroom; v5e/v6e (128 MiB) can use a higher limit."""
    try:
        cap = int(pltpu.get_tpu_info().vmem_capacity_bytes)
    except Exception:
        cap = 64 * 1024 * 1024
    if cap <= 64 * 1024 * 1024:          # v7x-class
        return 52 * 1024 * 1024
    return min(100 * 1024 * 1024, cap - 24 * 1024 * 1024)


def distinguish_model_forward(sentence_embedding, fused_params):
    """Mirrors DistinguishModel.forward after the RoBERTa pooler.

    Returns (regression_output (B,1), classification_logits (B,1), embedding).
    """
    B, D = sentence_embedding.shape
    H = fused_params[2].shape[0]          # wu_reg is (H, D)
    TB = _choose_batch_tile(B)
    grid = (B // TB,)

    # x fed as bf16: halves the per-step x DMA + double-buffered x VMEM; the
    # matmul operand is bf16-rounded anyway and the residual/LN path upcasts.
    x_bf16 = sentence_embedding.astype(jnp.bfloat16)

    def run(single_buffer_weights):
        x_spec = pl.BlockSpec((TB, D), lambda i: (i, 0))
        out_spec = pl.BlockSpec((TB, 2), lambda i: (i, 0))
        # Weights/biases: full-array blocks with constant index maps -> resident
        # in VMEM across all batch tiles. Single-buffered when supported (there
        # is nothing to prefetch across grid steps), halving their footprint.
        if single_buffer_weights:
            w_specs = [pl.BlockSpec(p.shape, lambda i: (0, 0),
                                    pipeline_mode=pl.Buffered(1))
                       for p in fused_params]
        else:
            w_specs = [pl.BlockSpec(p.shape, lambda i: (0, 0))
                       for p in fused_params]
        return pl.pallas_call(
            functools.partial(_fused_heads_kernel, hidden_dim=H),
            out_shape=jax.ShapeDtypeStruct((B, 2), jnp.float32),
            grid=grid,
            in_specs=[x_spec] + w_specs,
            out_specs=out_spec,
            compiler_params=pltpu.CompilerParams(
                dimension_semantics=("parallel",),
                vmem_limit_bytes=_pick_vmem_limit_bytes(),
            ),
        )(x_bf16, *fused_params)

    try:
        out = run(True)
    except Exception:
        # Fallback: default (double-buffered) weight specs if pipeline_mode /
        # Buffered(1) is not supported by this JAX version.
        out = run(False)

    regression_output = out[:, 0:1]
    classification_logits = out[:, 1:2]
    return regression_output, classification_logits, sentence_embedding


# ---------------------------- parameter set-up -----------------------------

def _linear_params(key, fan_in, fan_out):
    # PyTorch nn.Linear default init: U(-1/sqrt(fan_in), 1/sqrt(fan_in)).
    kw, kb = jax.random.split(key)
    bound = 1.0 / (fan_in ** 0.5)
    w = jax.random.uniform(kw, (fan_in, fan_out), jnp.float32, -bound, bound)
    b = jax.random.uniform(kb, (1, fan_out), jnp.float32, -bound, bound)
    return w, b


def make_head_params(key, dim, hidden_dim):
    k0, k1, k2 = jax.random.split(key, 3)
    wd, bd = _linear_params(k0, dim, hidden_dim)          # proj_down
    wu, bu = _linear_params(k1, hidden_dim, dim)          # proj_up
    gamma = jnp.ones((1, dim), jnp.float32)               # LayerNorm
    beta = jnp.zeros((1, dim), jnp.float32)
    wo, bo = _linear_params(k2, dim, 1)                   # Linear(dim, 1) -> (D, 1)
    return (wd, bd, wu, bu, gamma, beta, wo, bo)


def fuse_head_params(reg_params, cls_params):
    """Concat proj_down weights; block-diagonal concat of final Linear(D,1)
    weights; cast all matmul weights to bf16."""
    wd_r, bd_r, wu_r, bu_r, g_r, b_r, wo_r, bo_r = reg_params
    wd_c, bd_c, wu_c, bu_c, g_c, b_c, wo_c, bo_c = cls_params
    D = wd_r.shape[0]
    wd_cat = jnp.concatenate([wd_r, wd_c], axis=1).astype(jnp.bfloat16)  # (D, 2H)
    bd_cat = jnp.concatenate([bd_r, bd_c], axis=1)                       # (1, 2H)
    wo_cat = jnp.zeros((2 * D, 2), jnp.float32)
    wo_cat = wo_cat.at[:D, 0:1].set(wo_r).at[D:, 1:2].set(wo_c)
    wo_cat = wo_cat.astype(jnp.bfloat16)                                 # (2D, 2)
    bo_cat = jnp.concatenate([bo_r, bo_c], axis=1)                       # (1, 2)
    return (wd_cat, bd_cat,
            wu_r.astype(jnp.bfloat16), bu_r, g_r, b_r,
            wu_c.astype(jnp.bfloat16), bu_c, g_c, b_c,
            wo_cat, bo_cat)


# ------------------------- pure-JAX reference check -------------------------

def _reference_forward(x, fused_params):
    (wd, bd, wur, bur, gr, br, wuc, buc, gc, bc, wo, bo) = fused_params
    H = wur.shape[0]
    xb = x.astype(jnp.bfloat16)
    xf = xb.astype(jnp.float32)
    h = jnp.dot(xb, wd, preferred_element_type=jnp.float32) + bd
    h = _gelu_tanh(h)
    hb = h.astype(jnp.bfloat16)

    def head(hpart, wu, bu, g, beta):
        o = jnp.dot(hpart, wu, preferred_element_type=jnp.float32) + bu + xf
        mean = jnp.mean(o, axis=-1, keepdims=True)
        var = jnp.mean(o * o, axis=-1, keepdims=True) - mean * mean
        y = (o - mean) * jax.lax.rsqrt(var + LN_EPS) * g + beta
        return y.astype(jnp.bfloat16)

    y_r = head(hb[:, :H], wur, bur, gr, br)
    y_c = head(hb[:, H:], wuc, buc, gc, bc)
    y_cat = jnp.concatenate([y_r, y_c], axis=-1)
    logits = jnp.dot(y_cat, wo, preferred_element_type=jnp.float32) + bo
    return jax.nn.sigmoid(logits[:, 0:1]), logits[:, 1:2]


# ----------------------------------- main -----------------------------------

if __name__ == "__main__":
    # Small, TPU-friendly stand-ins for (roberta hidden=768, hidden_dim=1536).
    B, D, H = 8, 128, 256

    root = jax.random.PRNGKey(0)
    k_emb, k_reg, k_cls = jax.random.split(root, 3)

    # Stand-in for the RoBERTa pooled output (outputs[1]): (B, D) float32.
    sentence_embedding = jax.random.normal(k_emb, (B, D), jnp.float32)

    reg_params = make_head_params(k_reg, D, H)
    cls_params = make_head_params(k_cls, D, H)
    fused = fuse_head_params(reg_params, cls_params)

    reg_out, cls_logits, emb = distinguish_model_forward(sentence_embedding, fused)
    jax.block_until_ready((reg_out, cls_logits, emb))

    assert reg_out.shape == (B, 1)
    assert cls_logits.shape == (B, 1)
    assert emb.shape == (B, D)
    assert bool(jnp.all(jnp.isfinite(reg_out)))
    assert bool(jnp.all(jnp.isfinite(cls_logits)))
    assert bool(jnp.all((reg_out >= 0.0) & (reg_out <= 1.0)))  # sigmoid range

    # Numerical check against a pure-JAX reference using identical bf16 math.
    ref_reg, ref_cls = _reference_forward(sentence_embedding, fused)
    assert bool(jnp.allclose(reg_out, ref_reg, atol=2e-2, rtol=2e-2))
    assert bool(jnp.allclose(cls_logits, ref_cls, atol=2e-2, rtol=2e-2))

    print("KERNEL_OK")
</pallas_src>

<mosaic_0001>
module attributes {stable_mosaic.version = 11 : i64} {
  func.func @_fused_heads_kernel(%arg0: i32, %arg1: memref<8x128xbf16, #tpu.memory_space<vmem>>, %arg2: memref<128x512xbf16, #tpu.memory_space<vmem>>, %arg3: memref<1x512xf32, #tpu.memory_space<vmem>>, %arg4: memref<256x128xbf16, #tpu.memory_space<vmem>>, %arg5: memref<1x128xf32, #tpu.memory_space<vmem>>, %arg6: memref<1x128xf32, #tpu.memory_space<vmem>>, %arg7: memref<1x128xf32, #tpu.memory_space<vmem>>, %arg8: memref<256x128xbf16, #tpu.memory_space<vmem>>, %arg9: memref<1x128xf32, #tpu.memory_space<vmem>>, %arg10: memref<1x128xf32, #tpu.memory_space<vmem>>, %arg11: memref<1x128xf32, #tpu.memory_space<vmem>>, %arg12: memref<256x2xbf16, #tpu.memory_space<vmem>>, %arg13: memref<1x2xf32, #tpu.memory_space<vmem>>, %arg14: memref<8x2xf32, #tpu.memory_space<vmem>>) attributes {dimension_semantics = [#tpu.dimension_semantics<parallel>], iteration_bounds = array<i64: 1>, scalar_prefetch = 0 : i64, scratch_operands = 0 : i64, tpu.core_type = #tpu.core_type<tc>, window_params = [{transform_indices = @transform_0, window_bounds = array<i64: 8, 128>}, {pipeline_mode = #tpu.pipeline_mode<synchronous>, transform_indices = @transform_1, window_bounds = array<i64: 128, 512>}, {pipeline_mode = #tpu.pipeline_mode<synchronous>, transform_indices = @transform_2, window_bounds = array<i64: 1, 512>}, {pipeline_mode = #tpu.pipeline_mode<synchronous>, transform_indices = @transform_3, window_bounds = array<i64: 256, 128>}, {pipeline_mode = #tpu.pipeline_mode<synchronous>, transform_indices = @transform_4, window_bounds = array<i64: 1, 128>}, {pipeline_mode = #tpu.pipeline_mode<synchronous>, transform_indices = @transform_5, window_bounds = array<i64: 1, 128>}, {pipeline_mode = #tpu.pipeline_mode<synchronous>, transform_indices = @transform_6, window_bounds = array<i64: 1, 128>}, {pipeline_mode = #tpu.pipeline_mode<synchronous>, transform_indices = @transform_7, window_bounds = array<i64: 256, 128>}, {pipeline_mode = #tpu.pipeline_mode<synchronous>, transform_indices = @transform_8, window_bounds = array<i64: 1, 128>}, {pipeline_mode = #tpu.pipeline_mode<synchronous>, transform_indices = @transform_9, window_bounds = array<i64: 1, 128>}, {pipeline_mode = #tpu.pipeline_mode<synchronous>, transform_indices = @transform_10, window_bounds = array<i64: 1, 128>}, {pipeline_mode = #tpu.pipeline_mode<synchronous>, transform_indices = @transform_11, window_bounds = array<i64: 256, 2>}, {pipeline_mode = #tpu.pipeline_mode<synchronous>, transform_indices = @transform_12, window_bounds = array<i64: 1, 2>}, {transform_indices = @transform_13, window_bounds = array<i64: 8, 2>}]} {
    %c0 = arith.constant 0 : index
    %c0_0 = arith.constant 0 : index
    %0 = vector.load %arg1[%c0, %c0_0] : memref<8x128xbf16, #tpu.memory_space<vmem>>, vector<8x128xbf16>
    %1 = arith.extf %0 : vector<8x128xbf16> to vector<8x128xf32>
    %c0_1 = arith.constant 0 : index
    %c0_2 = arith.constant 0 : index
    %2 = vector.load %arg2[%c0_1, %c0_2] : memref<128x512xbf16, #tpu.memory_space<vmem>>, vector<128x512xbf16>
    %cst = arith.constant dense<0.000000e+00> : vector<8x512xf32>
    %3 = tpu.matmul %0, %2, %cst {dimension_numbers = #tpu.dot_dimension_numbers<[1], [0], [0], [1], [0, 0, 1, 1], [], []>} : vector<8x128xbf16>, vector<128x512xbf16>, vector<8x512xf32> -> vector<8x512xf32>
    %c0_3 = arith.constant 0 : index
    %c0_4 = arith.constant 0 : index
    %4 = vector.load %arg3[%c0_3, %c0_4] : memref<1x512xf32, #tpu.memory_space<vmem>>, vector<1x512xf32>
    %5 = vector.broadcast %4 : vector<1x512xf32> to vector<8x512xf32>
    %6 = arith.addf %3, %5 : vector<8x512xf32>
    %cst_5 = arith.constant 0.797884583 : f32
    %7 = vector.broadcast %cst_5 : f32 to vector<8x512xf32>
    %8 = arith.mulf %7, %6 : vector<8x512xf32>
    %9 = arith.mulf %6, %6 : vector<8x512xf32>
    %cst_6 = arith.constant 4.471500e-02 : f32
    %10 = vector.broadcast %cst_6 : f32 to vector<8x512xf32>
    %11 = arith.mulf %10, %9 : vector<8x512xf32>
    %cst_7 = arith.constant 1.000000e+00 : f32
    %12 = vector.broadcast %cst_7 : f32 to vector<8x512xf32>
    %13 = arith.addf %12, %11 : vector<8x512xf32>
    %14 = arith.mulf %8, %13 : vector<8x512xf32>
    %cst_8 = arith.constant 5.000000e-01 : f32
    %15 = vector.broadcast %cst_8 : f32 to vector<8x512xf32>
    %16 = arith.mulf %15, %6 : vector<8x512xf32>
    %17 = math.tanh %14 : vector<8x512xf32>
    %cst_9 = arith.constant 1.000000e+00 : f32
    %18 = vector.broadcast %cst_9 : f32 to vector<8x512xf32>
    %19 = arith.addf %18, %17 : vector<8x512xf32>
    %20 = arith.mulf %16, %19 : vector<8x512xf32>
    %21 = arith.truncf %20 : vector<8x512xf32> to vector<8x512xbf16>
    %22 = vector.extract_strided_slice %21 {offsets = [0, 0], sizes = [8, 256], strides = [1, 1]} : vector<8x512xbf16> to vector<8x256xbf16>
    %c0_10 = arith.constant 0 : index
    %c0_11 = arith.constant 0 : index
    %23 = vector.load %arg4[%c0_10, %c0_11] : memref<256x128xbf16, #tpu.memory_space<vmem>>, vector<256x128xbf16>
    %cst_12 = arith.constant dense<0.000000e+00> : vector<8x128xf32>
    %24 = tpu.matmul %22, %23, %cst_12 {dimension_numbers = #tpu.dot_dimension_numbers<[1], [0], [0], [1], [0, 0, 1, 1], [], []>} : vector<8x256xbf16>, vector<256x128xbf16>, vector<8x128xf32> -> vector<8x128xf32>
    %c0_13 = arith.constant 0 : index
    %c0_14 = arith.constant 0 : index
    %25 = vector.load %arg5[%c0_13, %c0_14] : memref<1x128xf32, #tpu.memory_space<vmem>>, vector<1x128xf32>
    %26 = vector.broadcast %25 : vector<1x128xf32> to vector<8x128xf32>
    %27 = arith.addf %24, %26 : vector<8x128xf32>
    %28 = arith.addf %27, %1 : vector<8x128xf32>
    %cst_15 = arith.constant dense<0.000000e+00> : vector<8xf32>
    %29 = vector.multi_reduction <add>, %28, %cst_15 [1] : vector<8x128xf32> to vector<8xf32>
    %30 = vector.shape_cast %29 : vector<8xf32> to vector<8x1xf32>
    %cst_16 = arith.constant 1.280000e+02 : f32
    %31 = vector.broadcast %cst_16 : f32 to vector<8x1xf32>
    %32 = arith.divf %30, %31 : vector<8x1xf32>
    %33 = arith.mulf %28, %28 : vector<8x128xf32>
    %cst_17 = arith.constant dense<0.000000e+00> : vector<8xf32>
    %34 = vector.multi_reduction <add>, %33, %cst_17 [1] : vector<8x128xf32> to vector<8xf32>
    %35 = vector.shape_cast %34 : vector<8xf32> to vector<8x1xf32>
    %cst_18 = arith.constant 1.280000e+02 : f32
    %36 = vector.broadcast %cst_18 : f32 to vector<8x1xf32>
    %37 = arith.divf %35, %36 : vector<8x1xf32>
    %38 = arith.mulf %32, %32 : vector<8x1xf32>
    %39 = arith.subf %37, %38 : vector<8x1xf32>
    %40 = vector.broadcast %32 : vector<8x1xf32> to vector<8x128xf32>
    %41 = arith.subf %28, %40 : vector<8x128xf32>
    %cst_19 = arith.constant 9.99999974E-6 : f32
    %42 = vector.broadcast %cst_19 : f32 to vector<8x1xf32>
    %43 = arith.addf %39, %42 : vector<8x1xf32>
    %44 = math.rsqrt %43 : vector<8x1xf32>
    %45 = vector.broadcast %44 : vector<8x1xf32> to vector<8x128xf32>
    %46 = arith.mulf %41, %45 : vector<8x128xf32>
    %c0_20 = arith.constant 0 : index
    %c0_21 = arith.constant 0 : index
    %47 = vector.load %arg6[%c0_20, %c0_21] : memref<1x128xf32, #tpu.memory_space<vmem>>, vector<1x128xf32>
    %48 = vector.broadcast %47 : vector<1x128xf32> to vector<8x128xf32>
    %49 = arith.mulf %46, %48 : vector<8x128xf32>
    %c0_22 = arith.constant 0 : index
    %c0_23 = arith.constant 0 : index
    %50 = vector.load %arg7[%c0_22, %c0_23] : memref<1x128xf32, #tpu.memory_space<vmem>>, vector<1x128xf32>
    %51 = vector.broadcast %50 : vector<1x128xf32> to vector<8x128xf32>
    %52 = arith.addf %49, %51 : vector<8x128xf32>
    %53 = arith.truncf %52 : vector<8x128xf32> to vector<8x128xbf16>
    %54 = vector.extract_strided_slice %21 {offsets = [0, 256], sizes = [8, 256], strides = [1, 1]} : vector<8x512xbf16> to vector<8x256xbf16>
    %c0_24 = arith.constant 0 : index
    %c0_25 = arith.constant 0 : index
    %55 = vector.load %arg8[%c0_24, %c0_25] : memref<256x128xbf16, #tpu.memory_space<vmem>>, vector<256x128xbf16>
    %cst_26 = arith.constant dense<0.000000e+00> : vector<8x128xf32>
    %56 = tpu.matmul %54, %55, %cst_26 {dimension_numbers = #tpu.dot_dimension_numbers<[1], [0], [0], [1], [0, 0, 1, 1], [], []>} : vector<8x256xbf16>, vector<256x128xbf16>, vector<8x128xf32> -> vector<8x128xf32>
    %c0_27 = arith.constant 0 : index
    %c0_28 = arith.constant 0 : index
    %57 = vector.load %arg9[%c0_27, %c0_28] : memref<1x128xf32, #tpu.memory_space<vmem>>, vector<1x128xf32>
    %58 = vector.broadcast %57 : vector<1x128xf32> to vector<8x128xf32>
    %59 = arith.addf %56, %58 : vector<8x128xf32>
    %60 = arith.addf %59, %1 : vector<8x128xf32>
    %cst_29 = arith.constant dense<0.000000e+00> : vector<8xf32>
    %61 = vector.multi_reduction <add>, %60, %cst_29 [1] : vector<8x128xf32> to vector<8xf32>
    %62 = vector.shape_cast %61 : vector<8xf32> to vector<8x1xf32>
    %cst_30 = arith.constant 1.280000e+02 : f32
    %63 = vector.broadcast %cst_30 : f32 to vector<8x1xf32>
    %64 = arith.divf %62, %63 : vector<8x1xf32>
    %65 = arith.mulf %60, %60 : vector<8x128xf32>
    %cst_31 = arith.constant dense<0.000000e+00> : vector<8xf32>
    %66 = vector.multi_reduction <add>, %65, %cst_31 [1] : vector<8x128xf32> to vector<8xf32>
    %67 = vector.shape_cast %66 : vector<8xf32> to vector<8x1xf32>
    %cst_32 = arith.constant 1.280000e+02 : f32
    %68 = vector.broadcast %cst_32 : f32 to vector<8x1xf32>
    %69 = arith.divf %67, %68 : vector<8x1xf32>
    %70 = arith.mulf %64, %64 : vector<8x1xf32>
    %71 = arith.subf %69, %70 : vector<8x1xf32>
    %72 = vector.broadcast %64 : vector<8x1xf32> to vector<8x128xf32>
    %73 = arith.subf %60, %72 : vector<8x128xf32>
    %cst_33 = arith.constant 9.99999974E-6 : f32
    %74 = vector.broadcast %cst_33 : f32 to vector<8x1xf32>
    %75 = arith.addf %71, %74 : vector<8x1xf32>
    %76 = math.rsqrt %75 : vector<8x1xf32>
    %77 = vector.broadcast %76 : vector<8x1xf32> to vector<8x128xf32>
    %78 = arith.mulf %73, %77 : vector<8x128xf32>
    %c0_34 = arith.constant 0 : index
    %c0_35 = arith.constant 0 : index
    %79 = vector.load %arg10[%c0_34, %c0_35] : memref<1x128xf32, #tpu.memory_space<vmem>>, vector<1x128xf32>
    %80 = vector.broadcast %79 : vector<1x128xf32> to vector<8x128xf32>
    %81 = arith.mulf %78, %80 : vector<8x128xf32>
    %c0_36 = arith.constant 0 : index
    %c0_37 = arith.constant 0 : index
    %82 = vector.load %arg11[%c0_36, %c0_37] : memref<1x128xf32, #tpu.memory_space<vmem>>, vector<1x128xf32>
    %83 = vector.broadcast %82 : vector<1x128xf32> to vector<8x128xf32>
    %84 = arith.addf %81, %83 : vector<8x128xf32>
    %85 = arith.truncf %84 : vector<8x128xf32> to vector<8x128xbf16>
    %86 = tpu.concatenate %53, %85 in 1 : vector<8x128xbf16>, vector<8x128xbf16> -> vector<8x256xbf16>
    %c0_38 = arith.constant 0 : index
    %c0_39 = arith.constant 0 : index
    %87 = vector.load %arg12[%c0_38, %c0_39] : memref<256x2xbf16, #tpu.memory_space<vmem>>, vector<256x2xbf16>
    %cst_40 = arith.constant dense<0.000000e+00> : vector<8x2xf32>
    %88 = tpu.matmul %86, %87, %cst_40 {dimension_numbers = #tpu.dot_dimension_numbers<[1], [0], [0], [1], [0, 0, 1, 1], [], []>} : vector<8x256xbf16>, vector<256x2xbf16>, vector<8x2xf32> -> vector<8x2xf32>
    %c0_41 = arith.constant 0 : index
    %c0_42 = arith.constant 0 : index
    %89 = vector.load %arg13[%c0_41, %c0_42] : memref<1x2xf32, #tpu.memory_space<vmem>>, vector<1x2xf32>
    %90 = vector.broadcast %89 : vector<1x2xf32> to vector<8x2xf32>
    %91 = arith.addf %88, %90 : vector<8x2xf32>
    %92 = vector.extract_strided_slice %91 {offsets = [0, 0], sizes = [8, 1], strides = [1, 1]} : vector<8x2xf32> to vector<8x1xf32>
    %93 = arith.negf %92 : vector<8x1xf32>
    %94 = math.exp %93 : vector<8x1xf32>
    %cst_43 = arith.constant 1.000000e+00 : f32
    %95 = vector.broadcast %cst_43 : f32 to vector<8x1xf32>
    %96 = arith.addf %95, %94 : vector<8x1xf32>
    %97 = arith.divf %95, %96 : vector<8x1xf32>
    %c0_44 = arith.constant 0 : index
    %c0_45 = arith.constant 0 : index
    %98 = vector.load %arg14[%c0_44, %c0_45] : memref<8x2xf32, #tpu.memory_space<vmem>>, vector<8x1xf32>
    tpu.vector_store %arg14[%c0_44, %c0_45], %97 {strides = array<i32>} : memref<8x2xf32, #tpu.memory_space<vmem>>, vector<8x1xf32>,
    %99 = vector.extract_strided_slice %91 {offsets = [0, 1], sizes = [8, 1], strides = [1, 1]} : vector<8x2xf32> to vector<8x1xf32>
    %c0_46 = arith.constant 0 : index
    %c1 = arith.constant 1 : index
    %100 = vector.load %arg14[%c0_46, %c1] : memref<8x2xf32, #tpu.memory_space<vmem>>, vector<8x1xf32>
    tpu.vector_store %arg14[%c0_46, %c1], %99 {strides = array<i32>} : memref<8x2xf32, #tpu.memory_space<vmem>>, vector<8x1xf32>,
    return
  }
  func.func @transform_0(%arg0: i32) -> (i32, i32) {
    %c0_i32 = arith.constant 0 : i32
    %c0_i32_0 = arith.constant 0 : i32
    return %arg0, %c0_i32 : i32, i32
  }
  func.func @transform_1(%arg0: i32) -> (i32, i32) {
    %c0_i32 = arith.constant 0 : i32
    %c0_i32_0 = arith.constant 0 : i32
    %c0_i32_1 = arith.constant 0 : i32
    return %c0_i32, %c0_i32_0 : i32, i32
  }
  func.func @transform_2(%arg0: i32) -> (i32, i32) {
    %c0_i32 = arith.constant 0 : i32
    %c0_i32_0 = arith.constant 0 : i32
    %c0_i32_1 = arith.constant 0 : i32
    return %c0_i32, %c0_i32_0 : i32, i32
  }
  func.func @transform_3(%arg0: i32) -> (i32, i32) {
    %c0_i32 = arith.constant 0 : i32
    %c0_i32_0 = arith.constant 0 : i32
    %c0_i32_1 = arith.constant 0 : i32
    return %c0_i32, %c0_i32_0 : i32, i32
  }
  func.func @transform_4(%arg0: i32) -> (i32, i32) {
    %c0_i32 = arith.constant 0 : i32
    %c0_i32_0 = arith.constant 0 : i32
    %c0_i32_1 = arith.constant 0 : i32
    return %c0_i32, %c0_i32_0 : i32, i32
  }
  func.func @transform_5(%arg0: i32) -> (i32, i32) {
    %c0_i32 = arith.constant 0 : i32
    %c0_i32_0 = arith.constant 0 : i32
    %c0_i32_1 = arith.constant 0 : i32
    return %c0_i32, %c0_i32_0 : i32, i32
  }
  func.func @transform_6(%arg0: i32) -> (i32, i32) {
    %c0_i32 = arith.constant 0 : i32
    %c0_i32_0 = arith.constant 0 : i32
    %c0_i32_1 = arith.constant 0 : i32
    return %c0_i32, %c0_i32_0 : i32, i32
  }
  func.func @transform_7(%arg0: i32) -> (i32, i32) {
    %c0_i32 = arith.constant 0 : i32
    %c0_i32_0 = arith.constant 0 : i32
    %c0_i32_1 = arith.constant 0 : i32
    return %c0_i32, %c0_i32_0 : i32, i32
  }
  func.func @transform_8(%arg0: i32) -> (i32, i32) {
    %c0_i32 = arith.constant 0 : i32
    %c0_i32_0 = arith.constant 0 : i32
    %c0_i32_1 = arith.constant 0 : i32
    return %c0_i32, %c0_i32_0 : i32, i32
  }
  func.func @transform_9(%arg0: i32) -> (i32, i32) {
    %c0_i32 = arith.constant 0 : i32
    %c0_i32_0 = arith.constant 0 : i32
    %c0_i32_1 = arith.constant 0 : i32
    return %c0_i32, %c0_i32_0 : i32, i32
  }
  func.func @transform_10(%arg0: i32) -> (i32, i32) {
    %c0_i32 = arith.constant 0 : i32
    %c0_i32_0 = arith.constant 0 : i32
    %c0_i32_1 = arith.constant 0 : i32
    return %c0_i32, %c0_i32_0 : i32, i32
  }
  func.func @transform_11(%arg0: i32) -> (i32, i32) {
    %c0_i32 = arith.constant 0 : i32
    %c0_i32_0 = arith.constant 0 : i32
    %c0_i32_1 = arith.constant 0 : i32
    return %c0_i32, %c0_i32_0 : i32, i32
  }
  func.func @transform_12(%arg0: i32) -> (i32, i32) {
    %c0_i32 = arith.constant 0 : i32
    %c0_i32_0 = arith.constant 0 : i32
    %c0_i32_1 = arith.constant 0 : i32
    return %c0_i32, %c0_i32_0 : i32, i32
  }
  func.func @transform_13(%arg0: i32) -> (i32, i32) {
    %c0_i32 = arith.constant 0 : i32
    %c0_i32_0 = arith.constant 0 : i32
    return %arg0, %c0_i32 : i32, i32
  }
}

module attributes {stable_mosaic.version = 11 : i64} {
  func.func @_fused_heads_kernel(%arg0: i32, %arg1: memref<8x128xbf16, #tpu.memory_space<vmem>>, %arg2: memref<128x512xbf16, #tpu.memory_space<vmem>>, %arg3: memref<1x512xf32, #tpu.memory_space<vmem>>, %arg4: memref<256x128xbf16, #tpu.memory_space<vmem>>, %arg5: memref<1x128xf32, #tpu.memory_space<vmem>>, %arg6: memref<1x128xf32, #tpu.memory_space<vmem>>, %arg7: memref<1x128xf32, #tpu.memory_space<vmem>>, %arg8: memref<256x128xbf16, #tpu.memory_space<vmem>>, %arg9: memref<1x128xf32, #tpu.memory_space<vmem>>, %arg10: memref<1x128xf32, #tpu.memory_space<vmem>>, %arg11: memref<1x128xf32, #tpu.memory_space<vmem>>, %arg12: memref<256x2xbf16, #tpu.memory_space<vmem>>, %arg13: memref<1x2xf32, #tpu.memory_space<vmem>>, %arg14: memref<8x2xf32, #tpu.memory_space<vmem>>) attributes {dimension_semantics = [#tpu.dimension_semantics<parallel>], iteration_bounds = array<i64: 1>, scalar_prefetch = 0 : i64, scratch_operands = 0 : i64, tpu.core_type = #tpu.core_type<tc>, window_params = [{transform_indices = @transform_0, window_bounds = array<i64: 8, 128>}, {pipeline_mode = #tpu.pipeline_mode<synchronous>, transform_indices = @transform_1, window_bounds = array<i64: 128, 512>}, {pipeline_mode = #tpu.pipeline_mode<synchronous>, transform_indices = @transform_2, window_bounds = array<i64: 1, 512>}, {pipeline_mode = #tpu.pipeline_mode<synchronous>, transform_indices = @transform_3, window_bounds = array<i64: 256, 128>}, {pipeline_mode = #tpu.pipeline_mode<synchronous>, transform_indices = @transform_4, window_bounds = array<i64: 1, 128>}, {pipeline_mode = #tpu.pipeline_mode<synchronous>, transform_indices = @transform_5, window_bounds = array<i64: 1, 128>}, {pipeline_mode = #tpu.pipeline_mode<synchronous>, transform_indices = @transform_6, window_bounds = array<i64: 1, 128>}, {pipeline_mode = #tpu.pipeline_mode<synchronous>, transform_indices = @transform_7, window_bounds = array<i64: 256, 128>}, {pipeline_mode = #tpu.pipeline_mode<synchronous>, transform_indices = @transform_8, window_bounds = array<i64: 1, 128>}, {pipeline_mode = #tpu.pipeline_mode<synchronous>, transform_indices = @transform_9, window_bounds = array<i64: 1, 128>}, {pipeline_mode = #tpu.pipeline_mode<synchronous>, transform_indices = @transform_10, window_bounds = array<i64: 1, 128>}, {pipeline_mode = #tpu.pipeline_mode<synchronous>, transform_indices = @transform_11, window_bounds = array<i64: 256, 2>}, {pipeline_mode = #tpu.pipeline_mode<synchronous>, transform_indices = @transform_12, window_bounds = array<i64: 1, 2>}, {transform_indices = @transform_13, window_bounds = array<i64: 8, 2>}]} {
    %c0 = arith.constant 0 : index
    %c0_0 = arith.constant 0 : index
    %0 = vector.load %arg1[%c0, %c0_0] : memref<8x128xbf16, #tpu.memory_space<vmem>>, vector<8x128xbf16>
    %1 = arith.extf %0 : vector<8x128xbf16> to vector<8x128xf32>
    %c0_1 = arith.constant 0 : index
    %c0_2 = arith.constant 0 : index
    %2 = vector.load %arg2[%c0_1, %c0_2] : memref<128x512xbf16, #tpu.memory_space<vmem>>, vector<128x512xbf16>
    %cst = arith.constant dense<0.000000e+00> : vector<8x512xf32>
    %3 = tpu.matmul %0, %2, %cst {dimension_numbers = #tpu.dot_dimension_numbers<[1], [0], [0], [1], [0, 0, 1, 1], [], []>} : vector<8x128xbf16>, vector<128x512xbf16>, vector<8x512xf32> -> vector<8x512xf32>
    %c0_3 = arith.constant 0 : index
    %c0_4 = arith.constant 0 : index
    %4 = vector.load %arg3[%c0_3, %c0_4] : memref<1x512xf32, #tpu.memory_space<vmem>>, vector<1x512xf32>
    %5 = vector.broadcast %4 : vector<1x512xf32> to vector<8x512xf32>
    %6 = arith.addf %3, %5 : vector<8x512xf32>
    %cst_5 = arith.constant 0.797884583 : f32
    %7 = vector.broadcast %cst_5 : f32 to vector<8x512xf32>
    %8 = arith.mulf %7, %6 : vector<8x512xf32>
    %9 = arith.mulf %6, %6 : vector<8x512xf32>
    %cst_6 = arith.constant 4.471500e-02 : f32
    %10 = vector.broadcast %cst_6 : f32 to vector<8x512xf32>
    %11 = arith.mulf %10, %9 : vector<8x512xf32>
    %cst_7 = arith.constant 1.000000e+00 : f32
    %12 = vector.broadcast %cst_7 : f32 to vector<8x512xf32>
    %13 = arith.addf %12, %11 : vector<8x512xf32>
    %14 = arith.mulf %8, %13 : vector<8x512xf32>
    %cst_8 = arith.constant 5.000000e-01 : f32
    %15 = vector.broadcast %cst_8 : f32 to vector<8x512xf32>
    %16 = arith.mulf %15, %6 : vector<8x512xf32>
    %17 = math.tanh %14 : vector<8x512xf32>
    %cst_9 = arith.constant 1.000000e+00 : f32
    %18 = vector.broadcast %cst_9 : f32 to vector<8x512xf32>
    %19 = arith.addf %18, %17 : vector<8x512xf32>
    %20 = arith.mulf %16, %19 : vector<8x512xf32>
    %21 = arith.truncf %20 : vector<8x512xf32> to vector<8x512xbf16>
    %22 = vector.extract_strided_slice %21 {offsets = [0, 0], sizes = [8, 256], strides = [1, 1]} : vector<8x512xbf16> to vector<8x256xbf16>
    %c0_10 = arith.constant 0 : index
    %c0_11 = arith.constant 0 : index
    %23 = vector.load %arg4[%c0_10, %c0_11] : memref<256x128xbf16, #tpu.memory_space<vmem>>, vector<256x128xbf16>
    %cst_12 = arith.constant dense<0.000000e+00> : vector<8x128xf32>
    %24 = tpu.matmul %22, %23, %cst_12 {dimension_numbers = #tpu.dot_dimension_numbers<[1], [0], [0], [1], [0, 0, 1, 1], [], []>} : vector<8x256xbf16>, vector<256x128xbf16>, vector<8x128xf32> -> vector<8x128xf32>
    %c0_13 = arith.constant 0 : index
    %c0_14 = arith.constant 0 : index
    %25 = vector.load %arg5[%c0_13, %c0_14] : memref<1x128xf32, #tpu.memory_space<vmem>>, vector<1x128xf32>
    %26 = vector.broadcast %25 : vector<1x128xf32> to vector<8x128xf32>
    %27 = arith.addf %24, %26 : vector<8x128xf32>
    %28 = arith.addf %27, %1 : vector<8x128xf32>
    %cst_15 = arith.constant dense<0.000000e+00> : vector<8xf32>
    %29 = vector.multi_reduction <add>, %28, %cst_15 [1] : vector<8x128xf32> to vector<8xf32>
    %30 = vector.shape_cast %29 : vector<8xf32> to vector<8x1xf32>
    %cst_16 = arith.constant 1.280000e+02 : f32
    %31 = vector.broadcast %cst_16 : f32 to vector<8x1xf32>
    %32 = arith.divf %30, %31 : vector<8x1xf32>
    %33 = arith.mulf %28, %28 : vector<8x128xf32>
    %cst_17 = arith.constant dense<0.000000e+00> : vector<8xf32>
    %34 = vector.multi_reduction <add>, %33, %cst_17 [1] : vector<8x128xf32> to vector<8xf32>
    %35 = vector.shape_cast %34 : vector<8xf32> to vector<8x1xf32>
    %cst_18 = arith.constant 1.280000e+02 : f32
    %36 = vector.broadcast %cst_18 : f32 to vector<8x1xf32>
    %37 = arith.divf %35, %36 : vector<8x1xf32>
    %38 = arith.mulf %32, %32 : vector<8x1xf32>
    %39 = arith.subf %37, %38 : vector<8x1xf32>
    %40 = vector.broadcast %32 : vector<8x1xf32> to vector<8x128xf32>
    %41 = arith.subf %28, %40 : vector<8x128xf32>
    %cst_19 = arith.constant 9.99999974E-6 : f32
    %42 = vector.broadcast %cst_19 : f32 to vector<8x1xf32>
    %43 = arith.addf %39, %42 : vector<8x1xf32>
    %44 = math.rsqrt %43 : vector<8x1xf32>
    %45 = vector.broadcast %44 : vector<8x1xf32> to vector<8x128xf32>
    %46 = arith.mulf %41, %45 : vector<8x128xf32>
    %c0_20 = arith.constant 0 : index
    %c0_21 = arith.constant 0 : index
    %47 = vector.load %arg6[%c0_20, %c0_21] : memref<1x128xf32, #tpu.memory_space<vmem>>, vector<1x128xf32>
    %48 = vector.broadcast %47 : vector<1x128xf32> to vector<8x128xf32>
    %49 = arith.mulf %46, %48 : vector<8x128xf32>
    %c0_22 = arith.constant 0 : index
    %c0_23 = arith.constant 0 : index
    %50 = vector.load %arg7[%c0_22, %c0_23] : memref<1x128xf32, #tpu.memory_space<vmem>>, vector<1x128xf32>
    %51 = vector.broadcast %50 : vector<1x128xf32> to vector<8x128xf32>
    %52 = arith.addf %49, %51 : vector<8x128xf32>
    %53 = arith.truncf %52 : vector<8x128xf32> to vector<8x128xbf16>
    %54 = vector.extract_strided_slice %21 {offsets = [0, 256], sizes = [8, 256], strides = [1, 1]} : vector<8x512xbf16> to vector<8x256xbf16>
    %c0_24 = arith.constant 0 : index
    %c0_25 = arith.constant 0 : index
    %55 = vector.load %arg8[%c0_24, %c0_25] : memref<256x128xbf16, #tpu.memory_space<vmem>>, vector<256x128xbf16>
    %cst_26 = arith.constant dense<0.000000e+00> : vector<8x128xf32>
    %56 = tpu.matmul %54, %55, %cst_26 {dimension_numbers = #tpu.dot_dimension_numbers<[1], [0], [0], [1], [0, 0, 1, 1], [], []>} : vector<8x256xbf16>, vector<256x128xbf16>, vector<8x128xf32> -> vector<8x128xf32>
    %c0_27 = arith.constant 0 : index
    %c0_28 = arith.constant 0 : index
    %57 = vector.load %arg9[%c0_27, %c0_28] : memref<1x128xf32, #tpu.memory_space<vmem>>, vector<1x128xf32>
    %58 = vector.broadcast %57 : vector<1x128xf32> to vector<8x128xf32>
    %59 = arith.addf %56, %58 : vector<8x128xf32>
    %60 = arith.addf %59, %1 : vector<8x128xf32>
    %cst_29 = arith.constant dense<0.000000e+00> : vector<8xf32>
    %61 = vector.multi_reduction <add>, %60, %cst_29 [1] : vector<8x128xf32> to vector<8xf32>
    %62 = vector.shape_cast %61 : vector<8xf32> to vector<8x1xf32>
    %cst_30 = arith.constant 1.280000e+02 : f32
    %63 = vector.broadcast %cst_30 : f32 to vector<8x1xf32>
    %64 = arith.divf %62, %63 : vector<8x1xf32>
    %65 = arith.mulf %60, %60 : vector<8x128xf32>
    %cst_31 = arith.constant dense<0.000000e+00> : vector<8xf32>
    %66 = vector.multi_reduction <add>, %65, %cst_31 [1] : vector<8x128xf32> to vector<8xf32>
    %67 = vector.shape_cast %66 : vector<8xf32> to vector<8x1xf32>
    %cst_32 = arith.constant 1.280000e+02 : f32
    %68 = vector.broadcast %cst_32 : f32 to vector<8x1xf32>
    %69 = arith.divf %67, %68 : vector<8x1xf32>
    %70 = arith.mulf %64, %64 : vector<8x1xf32>
    %71 = arith.subf %69, %70 : vector<8x1xf32>
    %72 = vector.broadcast %64 : vector<8x1xf32> to vector<8x128xf32>
    %73 = arith.subf %60, %72 : vector<8x128xf32>
    %cst_33 = arith.constant 9.99999974E-6 : f32
    %74 = vector.broadcast %cst_33 : f32 to vector<8x1xf32>
    %75 = arith.addf %71, %74 : vector<8x1xf32>
    %76 = math.rsqrt %75 : vector<8x1xf32>
    %77 = vector.broadcast %76 : vector<8x1xf32> to vector<8x128xf32>
    %78 = arith.mulf %73, %77 : vector<8x128xf32>
    %c0_34 = arith.constant 0 : index
    %c0_35 = arith.constant 0 : index
    %79 = vector.load %arg10[%c0_34, %c0_35] : memref<1x128xf32, #tpu.memory_space<vmem>>, vector<1x128xf32>
    %80 = vector.broadcast %79 : vector<1x128xf32> to vector<8x128xf32>
    %81 = arith.mulf %78, %80 : vector<8x128xf32>
    %c0_36 = arith.constant 0 : index
    %c0_37 = arith.constant 0 : index
    %82 = vector.load %arg11[%c0_36, %c0_37] : memref<1x128xf32, #tpu.memory_space<vmem>>, vector<1x128xf32>
    %83 = vector.broadcast %82 : vector<1x128xf32> to vector<8x128xf32>
    %84 = arith.addf %81, %83 : vector<8x128xf32>
    %85 = arith.truncf %84 : vector<8x128xf32> to vector<8x128xbf16>
    %86 = tpu.concatenate %53, %85 in 1 : vector<8x128xbf16>, vector<8x128xbf16> -> vector<8x256xbf16>
    %c0_38 = arith.constant 0 : index
    %c0_39 = arith.constant 0 : index
    %87 = vector.load %arg12[%c0_38, %c0_39] : memref<256x2xbf16, #tpu.memory_space<vmem>>, vector<256x2xbf16>
    %cst_40 = arith.constant dense<0.000000e+00> : vector<8x2xf32>
    %88 = tpu.matmul %86, %87, %cst_40 {dimension_numbers = #tpu.dot_dimension_numbers<[1], [0], [0], [1], [0, 0, 1, 1], [], []>} : vector<8x256xbf16>, vector<256x2xbf16>, vector<8x2xf32> -> vector<8x2xf32>
    %c0_41 = arith.constant 0 : index
    %c0_42 = arith.constant 0 : index
    %89 = vector.load %arg13[%c0_41, %c0_42] : memref<1x2xf32, #tpu.memory_space<vmem>>, vector<1x2xf32>
    %90 = vector.broadcast %89 : vector<1x2xf32> to vector<8x2xf32>
    %91 = arith.addf %88, %90 : vector<8x2xf32>
    %92 = vector.extract_strided_slice %91 {offsets = [0, 0], sizes = [8, 1], strides = [1, 1]} : vector<8x2xf32> to vector<8x1xf32>
    %93 = arith.negf %92 : vector<8x1xf32>
    %94 = math.exp %93 : vector<8x1xf32>
    %cst_43 = arith.constant 1.000000e+00 : f32
    %95 = vector.broadcast %cst_43 : f32 to vector<8x1xf32>
    %96 = arith.addf %95, %94 : vector<8x1xf32>
    %97 = arith.divf %95, %96 : vector<8x1xf32>
    %c0_44 = arith.constant 0 : index
    %c0_45 = arith.constant 0 : index
    %98 = vector.load %arg14[%c0_44, %c0_45] : memref<8x2xf32, #tpu.memory_space<vmem>>, vector<8x1xf32>
    tpu.vector_store %arg14[%c0_44, %c0_45], %97 {strides = array<i32>} : memref<8x2xf32, #tpu.memory_space<vmem>>, vector<8x1xf32>,
    %99 = vector.extract_strided_slice %91 {offsets = [0, 1], sizes = [8, 1], strides = [1, 1]} : vector<8x2xf32> to vector<8x1xf32>
    %c0_46 = arith.constant 0 : index
    %c1 = arith.constant 1 : index
    %100 = vector.load %arg14[%c0_46, %c1] : memref<8x2xf32, #tpu.memory_space<vmem>>, vector<8x1xf32>
    tpu.vector_store %arg14[%c0_46, %c1], %99 {strides = array<i32>} : memref<8x2xf32, #tpu.memory_space<vmem>>, vector<8x1xf32>,
    return
  }
  func.func @transform_0(%arg0: i32) -> (i32, i32) {
    %c0_i32 = arith.constant 0 : i32
    %c0_i32_0 = arith.constant 0 : i32
    return %arg0, %c0_i32 : i32, i32
  }
  func.func @transform_1(%arg0: i32) -> (i32, i32) {
    %c0_i32 = arith.constant 0 : i32
    %c0_i32_0 = arith.constant 0 : i32
    %c0_i32_1 = arith.constant 0 : i32
    return %c0_i32, %c0_i32_0 : i32, i32
  }
  func.func @transform_2(%arg0: i32) -> (i32, i32) {
    %c0_i32 = arith.constant 0 : i32
    %c0_i32_0 = arith.constant 0 : i32
    %c0_i32_1 = arith.constant 0 : i32
    return %c0_i32, %c0_i32_0 : i32, i32
  }
  func.func @transform_3(%arg0: i32) -> (i32, i32) {
    %c0_i32 = arith.constant 0 : i32
    %c0_i32_0 = arith.constant 0 : i32
    %c0_i32_1 = arith.constant 0 : i32
    return %c0_i32, %c0_i32_0 : i32, i32
  }
  func.func @transform_4(%arg0: i32) -> (i32, i32) {
    %c0_i32 = arith.constant 0 : i32
    %c0_i32_0 = arith.constant 0 : i32
    %c0_i32_1 = arith.constant 0 : i32
    return %c0_i32, %c0_i32_0 : i32, i32
  }
  func.func @transform_5(%arg0: i32) -> (i32, i32) {
    %c0_i32 = arith.constant 0 : i32
    %c0_i32_0 = arith.constant 0 : i32
    %c0_i32_1 = arith.constant 0 : i32
    return %c0_i32, %c0_i32_0 : i32, i32
  }
  func.func @transform_6(%arg0: i32) -> (i32, i32) {
    %c0_i32 = arith.constant 0 : i32
    %c0_i32_0 = arith.constant 0 : i32
    %c0_i32_1 = arith.constant 0 : i32
    return %c0_i32, %c0_i32_0 : i32, i32
  }
  func.func @transform_7(%arg0: i32) -> (i32, i32) {
    %c0_i32 = arith.constant 0 : i32
    %c0_i32_0 = arith.constant 0 : i32
    %c0_i32_1 = arith.constant 0 : i32
    return %c0_i32, %c0_i32_0 : i32, i32
  }
  func.func @transform_8(%arg0: i32) -> (i32, i32) {
    %c0_i32 = arith.constant 0 : i32
    %c0_i32_0 = arith.constant 0 : i32
    %c0_i32_1 = arith.constant 0 : i32
    return %c0_i32, %c0_i32_0 : i32, i32
  }
  func.func @transform_9(%arg0: i32) -> (i32, i32) {
    %c0_i32 = arith.constant 0 : i32
    %c0_i32_0 = arith.constant 0 : i32
    %c0_i32_1 = arith.constant 0 : i32
    return %c0_i32, %c0_i32_0 : i32, i32
  }
  func.func @transform_10(%arg0: i32) -> (i32, i32) {
    %c0_i32 = arith.constant 0 : i32
    %c0_i32_0 = arith.constant 0 : i32
    %c0_i32_1 = arith.constant 0 : i32
    return %c0_i32, %c0_i32_0 : i32, i32
  }
  func.func @transform_11(%arg0: i32) -> (i32, i32) {
    %c0_i32 = arith.constant 0 : i32
    %c0_i32_0 = arith.constant 0 : i32
    %c0_i32_1 = arith.constant 0 : i32
    return %c0_i32, %c0_i32_0 : i32, i32
  }
  func.func @transform_12(%arg0: i32) -> (i32, i32) {
    %c0_i32 = arith.constant 0 : i32
    %c0_i32_0 = arith.constant 0 : i32
    %c0_i32_1 = arith.constant 0 : i32
    return %c0_i32, %c0_i32_0 : i32, i32
  }
  func.func @transform_13(%arg0: i32) -> (i32, i32) {
    %c0_i32 = arith.constant 0 : i32
    %c0_i32_0 = arith.constant 0 : i32
    return %arg0, %c0_i32 : i32, i32
  }
}

</mosaic_0001>

<bundles_post_ra>
// kernel: tpu_custom_call.1
= control target key start
LH: loop header
LB: loop body
LE: loop exit
PB: predicated region body
PF: predicated region fallthrough
CT: control target
= control target key end

     0   :  { %18 = vsyncpa [#allocation3], 0  ;;  %s1760_s0 = inlined_call_operand.hbm [shape: bf16[8,128], index: 0, kind: input, shape index: {}]   ;;  %s1761_s1 = inlined_call_operand.hbm [shape: bf16[128,512], index: 1, kind: input, shape index: {}]   ;;  %s1762_s2 = inlined_call_operand.hbm [shape: f32[1,512], index: 2, kind: input, shape index: {}]   ;;  %s1763_s3 = inlined_call_operand.vmem [shape: bf16[256,128], index: 3, kind: input, shape index: {}]   ;;  %s1764_s4 = inlined_call_operand.vmem [shape: f32[1,128], index: 4, kind: input, shape index: {}]   ;;  %s1765_s5 = inlined_call_operand.vmem [shape: f32[1,128], index: 5, kind: input, shape index: {}]   ;;  %s1766_s6 = inlined_call_operand.vmem [shape: f32[1,128], index: 6, kind: input, shape index: {}]   ;;  %s1767_s7 = inlined_call_operand.hbm [shape: bf16[256,128], index: 7, kind: input, shape index: {}]   ;;  %s1768_s8 = inlined_call_operand.vmem [shape: f32[1,128], index: 8, kind: input, shape index: {}]   ;;  %s1769_s9 = inlined_call_operand.vmem [shape: f32[1,128], index: 9, kind: input, shape index: {}]   ;;  %s1770_s10 = inlined_call_operand.vmem [shape: f32[1,128], index: 10, kind: input, shape index: {}]   ;;  %s1771_s11 = inlined_call_operand.vmem [shape: bf16[256,2], index: 11, kind: input, shape index: {}]   ;;  %s1772_s12 = inlined_call_operand.vmem [shape: f32[1,2], index: 12, kind: input, shape index: {}]   ;;  %s1773_s13 = inlined_call_operand.vmem [shape: f32[8,2], index: 13, kind: output, shape index: {}]  }
   0x1   :  { %19 = vsyncpa [#allocation5], 0  ;;  %s36_s27 = sshll.u32 %s1761_s1, 4  ;;  %s37_s27 = int_to_ptr.hbm [resolvable:$true] %s36_s27 }
   0x2   :  { %20 = vsyncpa [#allocation8], 0  ;;  %s1527_s28 = smov [#allocation4]   ;;  %s26_s15 = sshll.u32 %s1760_s0, 4  ;;  %s27_s15 = int_to_ptr.hbm [resolvable:$true] %s26_s15 }
   0x3   :  { %s38_s29 = sshll.u32 %s1527_s28, 4  ;;  %s1528_s16 = smov 256   ;;  %s39_s29 = int_to_ptr.vmem [resolvable:$true] %s38_s29 }
   0x4   :  { %s1529_s17 = smov 16   ;;  %s1530_s18 = smov [#allocation2]  }
   0x5   :  { %44 = dma.hbm_to_vmem [thread:$0]  %s37_s27, 4096, %s39_s29, [#allocation5], %s1528_s16, %s1528_s16, %s1529_s17  }
   0x6   :  { %s28_s19 = sshll.u32 %s1530_s18, 4  ;;  %s50_s22 = sshll.u32 %s1762_s2, 4  ;;  %s29_s19 = int_to_ptr.vmem [resolvable:$true] %s28_s19  ;;  %s51_s22 = int_to_ptr.hbm [resolvable:$true] %s50_s22 }
   0x7   :  { %31 = dma.hbm_to_vmem [thread:$0]  %s27_s15, 64, %s29_s19, [#allocation3]  }
   0x8   :  { %s68_s24 = sshll.u32 %s1767_s7, 4  ;;  %s1531_s25 = smov [#allocation6]   ;;  %s69_s24 = int_to_ptr.hbm [resolvable:$true] %s68_s24 }
   0x9   :  { %s52_s26 = sshll.u32 %s1531_s25, 4  ;;  %s1532_s0 = smov [#allocation7]   ;;  %s53_s26 = int_to_ptr.vmem [resolvable:$true] %s52_s26 }
   0xa   :  { %55 = dma.hbm_to_vmem [thread:$0]  %s51_s22, 64, %s53_s26, [#allocation5]  }
   0xb   :  { %s70_s27 = sshll.u32 %s1532_s0, 4  ;;  %s1533_s28 = smov 64   ;;  %s71_s27 = int_to_ptr.vmem [resolvable:$true] %s70_s27 }
   0xc   :  { %s1534_s29 = smov 4  }
   0xd   :  { %76 = dma.hbm_to_vmem [thread:$0]  %s69_s24, 2048, %s71_s27, [#allocation8], %s1533_s28, %s1533_s28, %s1534_s29  }
   0xe   :  { %1521 = dma.done.wait [#allocation3], 64  }
   0xf   :  { %1522 = vsyncadd [#allocation3], 4294967232 }
  0x10   :  { %1523 = dma.done.wait [#allocation5], 4160  }
  0x11   :  { %1524 = vsyncadd [#allocation5], 4294963136 }
  0x12   :  { %1525 = dma.done.wait [#allocation8], 2048  }
  0x13   :  { %1526 = vsyncadd [#allocation8], 4294965248  ;;  %v1104_v0 = vld [vmem:[#allocation4 + $0xe0] sm:$0xf]  ;;  %v1341_v1 = vld [vmem:[#allocation4 + $0xec] sm:$0xf0] }
  0x14   :  { %v1339_v2 = vld [vmem:[#allocation4 + $0xe4] sm:$0xf]  ;;  %v1105_v3 = vor.u32 %v1341_v1, %v1104_v0  ;;  %v1106_v4 = vld [vmem:[#allocation4 + $0xf0] sm:$0xf0]  ;;  %v1112_v5 = vld [vmem:[#allocation4 + $0xe8] sm:$0xf] }
  0x15   :  { %v1342_v6 = vld [vmem:[#allocation4 + $0xf4] sm:$0xf0]  ;;  %v1109_v7 = vor.u32 %v1339_v2, %v1106_v4  ;;  %v1340_v9 = vld [vmem:[#allocation4 + $0xec] sm:$0xf]  ;;  %v1114_v10 = vld [vmem:[#allocation4 + $0xf8] sm:$0xf0] }
  0x16   :  { %v1113_v8 = vor.u32 %v1342_v6, %v1112_v5  ;;  %v1088_v11 = vld [vmem:[#allocation4 + $0xc0] sm:$0xf]  ;;  %307 = vmatpush.bf16.msra.mxu0 %v1105_v3  ;;  %v1117_v12 = vor.u32 %v1340_v9, %v1114_v10  ;;  %v1337_v13 = vld [vmem:[#allocation4 + $0xcc] sm:$0xf0]  ;;  %v1335_v14 = vld [vmem:[#allocation4 + $0xc4] sm:$0xf] }
  0x17   :  { %v1090_v15 = vld [vmem:[#allocation4 + $0xd0] sm:$0xf0]  ;;  %320 = vmatpush.bf16.msra.mxu1 %v1109_v7  ;;  %v1089_v16 = vor.u32 %v1337_v13, %v1088_v11  ;;  %v1096_v18 = vld [vmem:[#allocation4 + $0xc8] sm:$0xf]  ;;  %v1338_v19 = vld [vmem:[#allocation4 + $0xd4] sm:$0xf0] }
  0x18   :  { %333 = vmatpush.bf16.msra.mxu2 %v1113_v8  ;;  %v1093_v17 = vor.u32 %v1335_v14, %v1090_v15  ;;  %v1336_v20 = vld [vmem:[#allocation4 + $0xcc] sm:$0xf]  ;;  %346 = vmatpush.bf16.msra.mxu3 %v1117_v12  ;;  %v1097_v21 = vor.u32 %v1338_v19, %v1096_v18  ;;  %v1098_v22 = vld [vmem:[#allocation4 + $0xd8] sm:$0xf0]  ;;  %v1072_v23 = vld [vmem:[#allocation4 + $0xa0] sm:$0xf] }
  0x19   :  { %v1333_v24 = vld [vmem:[#allocation4 + $0xac] sm:$0xf0]  ;;  %v1101_v25 = vor.u32 %v1336_v20, %v1098_v22  ;;  %v1331_v26 = vld [vmem:[#allocation4 + $0xa4] sm:$0xf]  ;;  %v1074_v27 = vld [vmem:[#allocation4 + $0xb0] sm:$0xf0] }
  0x1a   :  { %v1080_v28 = vld [vmem:[#allocation4 + $0xa8] sm:$0xf]  ;;  %308 = vmatpush.bf16.msra.mxu0 %v1089_v16  ;;  %v1073_v29 = vor.u32 %v1333_v24, %v1072_v23  ;;  %v1334_v30 = vld [vmem:[#allocation4 + $0xb4] sm:$0xf0]  ;;  %v1332_v31 = vld [vmem:[#allocation4 + $0xac] sm:$0xf]  ;;  %v1077_v33 = vor.u32 %v1331_v26, %v1074_v27 }
  0x1b   :  { %v1082_v32 = vld [vmem:[#allocation4 + $0xb8] sm:$0xf0]  ;;  %321 = vmatpush.bf16.msra.mxu1 %v1093_v17  ;;  %v1081_v34 = vor.u32 %v1334_v30, %v1080_v28  ;;  %v1056_v35 = vld [vmem:[#allocation4 + $0x80] sm:$0xf]  ;;  %v1329_v36 = vld [vmem:[#allocation4 + $0x8c] sm:$0xf0] }
  0x1c   :  { %334 = vmatpush.bf16.msra.mxu2 %v1097_v21  ;;  %v1327_v37 = vld [vmem:[#allocation4 + $0x84] sm:$0xf]  ;;  %347 = vmatpush.bf16.msra.mxu3 %v1101_v25  ;;  %v1085_v38 = vor.u32 %v1332_v31, %v1082_v32  ;;  %v1058_v39 = vld [vmem:[#allocation4 + $0x90] sm:$0xf0]  ;;  %v1064_v40 = vld [vmem:[#allocation4 + $0x88] sm:$0xf]  ;;  %v1057_v44 = vor.u32 %v1329_v36, %v1056_v35 }
  0x1d   :  { %v1330_v41 = vld [vmem:[#allocation4 + $0x94] sm:$0xf0]  ;;  %v1328_v42 = vld [vmem:[#allocation4 + $0x8c] sm:$0xf]  ;;  %v1066_v43 = vld [vmem:[#allocation4 + $0x98] sm:$0xf0]  ;;  %v1061_v45 = vor.u32 %v1327_v37, %v1058_v39 }
  0x1e   :  { %309 = vmatpush.bf16.msra.mxu0 %v1073_v29  ;;  %v1065_v46 = vor.u32 %v1330_v41, %v1064_v40  ;;  %v1040_v47 = vld [vmem:[#allocation4 + $0x60] sm:$0xf]  ;;  %v1325_v48 = vld [vmem:[#allocation4 + $0x6c] sm:$0xf0]  ;;  %v1323_v49 = vld [vmem:[#allocation4 + $0x64] sm:$0xf]  ;;  %v1069_v50 = vor.u32 %v1328_v42, %v1066_v43 }
  0x1f   :  { %322 = vmatpush.bf16.msra.mxu1 %v1077_v33  ;;  %v1042_v51 = vld [vmem:[#allocation4 + $0x70] sm:$0xf0]  ;;  %v1048_v52 = vld [vmem:[#allocation4 + $0x68] sm:$0xf]  ;;  %v1326_v53 = vld [vmem:[#allocation4 + $0x74] sm:$0xf0]  ;;  %v1041_v56 = vor.u32 %v1325_v48, %v1040_v47 }
  0x20   :  { %335 = vmatpush.bf16.msra.mxu2 %v1081_v34  ;;  %348 = vmatpush.bf16.msra.mxu3 %v1085_v38  ;;  %v1324_v54 = vld [vmem:[#allocation4 + $0x6c] sm:$0xf]  ;;  %v1050_v55 = vld [vmem:[#allocation4 + $0x78] sm:$0xf0]  ;;  %v1045_v57 = vor.u32 %v1323_v49, %v1042_v51  ;;  %v1049_v58 = vor.u32 %v1326_v53, %v1048_v52  ;;  %v1024_v59 = vld [vmem:[#allocation4 + $0x40] sm:$0xf] }
  0x21   :  { %v1321_v60 = vld [vmem:[#allocation4 + $0x4c] sm:$0xf0]  ;;  %v1319_v61 = vld [vmem:[#allocation4 + $0x44] sm:$0xf]  ;;  %v1053_v62 = vor.u32 %v1324_v54, %v1050_v55  ;;  %v1026_v63 = vld [vmem:[#allocation4 + $0x50] sm:$0xf0] }
  0x22   :  { %310 = vmatpush.bf16.msra.mxu0 %v1057_v44  ;;  %v1032_v0 = vld [vmem:[#allocation4 + $0x48] sm:$0xf]  ;;  %v1322_v1 = vld [vmem:[#allocation4 + $0x54] sm:$0xf0]  ;;  %v1320_v2 = vld [vmem:[#allocation4 + $0x4c] sm:$0xf]  ;;  %v1025_v4 = vor.u32 %v1321_v60, %v1024_v59  ;;  %v1029_v7 = vor.u32 %v1319_v61, %v1026_v63 }
  0x23   :  { %323 = vmatpush.bf16.msra.mxu1 %v1061_v45  ;;  %v1034_v3 = vld [vmem:[#allocation4 + $0x58] sm:$0xf0]  ;;  %v1008_v5 = vld [vmem:[#allocation4 + $0x20] sm:$0xf]  ;;  %v1317_v6 = vld [vmem:[#allocation4 + $0x2c] sm:$0xf0]  ;;  %v1033_v8 = vor.u32 %v1322_v1, %v1032_v0 }
  0x24   :  { %336 = vmatpush.bf16.msra.mxu2 %v1065_v46  ;;  %349 = vmatpush.bf16.msra.mxu3 %v1069_v50  ;;  %v1315_v9 = vld [vmem:[#allocation4 + $0x24] sm:$0xf]  ;;  %v1010_v10 = vld [vmem:[#allocation4 + $0x30] sm:$0xf0]  ;;  %v1016_v11 = vld [vmem:[#allocation4 + $0x28] sm:$0xf]  ;;  %v1037_v12 = vor.u32 %v1320_v2, %v1034_v3  ;;  %v1009_v18 = vor.u32 %v1317_v6, %v1008_v5 }
  0x25   :  { %v1318_v13 = vld [vmem:[#allocation4 + $0x34] sm:$0xf0]  ;;  %v1316_v14 = vld [vmem:[#allocation4 + $0x2c] sm:$0xf]  ;;  %v1018_v15 = vld [vmem:[#allocation4 + $0x38] sm:$0xf0]  ;;  %v1013_v21 = vor.u32 %v1315_v9, %v1010_v10 }
  0x26   :  { %311 = vmatpush.bf16.msra.mxu0 %v1041_v56  ;;  %v992_v16 = vld [vmem:[#allocation4] sm:$0xf]  ;;  %v1313_v17 = vld [vmem:[#allocation4 + $0xc] sm:$0xf0]  ;;  %v1311_v19 = vld [vmem:[#allocation4 + $0x4] sm:$0xf]  ;;  %v1017_v22 = vor.u32 %v1318_v13, %v1016_v11  ;;  %v1021_v23 = vor.u32 %v1316_v14, %v1018_v15 }
  0x27   :  { %324 = vmatpush.bf16.msra.mxu1 %v1045_v57  ;;  %v994_v20 = vld [vmem:[#allocation4 + $0x10] sm:$0xf0]  ;;  %v1000_v24 = vld [vmem:[#allocation4 + $0x8] sm:$0xf]  ;;  %v1314_v25 = vld [vmem:[#allocation4 + $0x14] sm:$0xf0]  ;;  %v993_v28 = vor.u32 %v1313_v17, %v992_v16 }
  0x28   :  { %337 = vmatpush.bf16.msra.mxu2 %v1049_v58  ;;  %350 = vmatpush.bf16.msra.mxu3 %v1053_v62  ;;  %v1312_v26 = vld [vmem:[#allocation4 + $0xc] sm:$0xf]  ;;  %v1002_v27 = vld [vmem:[#allocation4 + $0x18] sm:$0xf0]  ;;  %v997_v29 = vor.u32 %v1311_v19, %v994_v20  ;;  %v1001_v30 = vor.u32 %v1314_v25, %v1000_v24  ;;  %v1350_v32 = vld [vmem:[%s1763_s3 + $0x38] sm:$0xff]  ;;  %vm979_vm10 = vcmask 7168  }
  0x29   :  { %v1005_v31 = vor.u32 %v1312_v26, %v1002_v27  ;;  %v1358_v33 = vld [vmem:[%s1763_s3 + $0x78] sm:$0xff]  ;;  %v1624_v34 = vld [vmem:[#allocation2] sm:$0xf]  ;;  %v1349_v35 = vld [vmem:[%s1763_s3 + $0x30] sm:$0xff]  ;;  %vm981_vm12 = vcmask 15368  }
  0x2a   :  { %312 = vmatpush.bf16.msra.mxu0 %v1025_v4  ;;  %v1357_v36 = vld [vmem:[%s1763_s3 + $0x70] sm:$0xff]  ;;  %v1366_v37 = vld [vmem:[#allocation7 + $0x38] sm:$0xff]  ;;  %v1348_v39 = vld [vmem:[%s1763_s3 + $0x28] sm:$0xff] }
  0x2b   :  { %325 = vmatpush.bf16.msra.mxu1 %v1029_v7  ;;  %v1374_v38 = vld [vmem:[#allocation7 + $0x78] sm:$0xff]  ;;  %v1356_v40 = vld [vmem:[%s1763_s3 + $0x68] sm:$0xff]  ;;  %v1365_v41 = vld [vmem:[#allocation7 + $0x30] sm:$0xff] }
  0x2c   :  { %338 = vmatpush.bf16.msra.mxu2 %v1033_v8  ;;  %351 = vmatpush.bf16.msra.mxu3 %v1037_v12  ;;  %v1373_v42 = vld [vmem:[#allocation7 + $0x70] sm:$0xff]  ;;  %v1347_v43 = vld [vmem:[%s1763_s3 + $0x20] sm:$0xff]  ;;  %v1364_v45 = vld [vmem:[#allocation7 + $0x28] sm:$0xff] }
  0x2d   :  { %v1355_v44 = vld [vmem:[%s1763_s3 + $0x60] sm:$0xff]  ;;  %v1372_v46 = vld [vmem:[#allocation7 + $0x68] sm:$0xff]  ;;  %v1346_v47 = vld [vmem:[%s1763_s3 + $0x18] sm:$0xff] }
  0x2e   :  { %313 = vmatpush.bf16.msra.mxu0 %v1009_v18  ;;  %v1354_v48 = vld [vmem:[%s1763_s3 + $0x58] sm:$0xff]  ;;  %v1363_v49 = vld [vmem:[#allocation7 + $0x20] sm:$0xff]  ;;  %v1345_v51 = vld [vmem:[%s1763_s3 + $0x10] sm:$0xff] }
  0x2f   :  { %326 = vmatpush.bf16.msra.mxu1 %v1013_v21  ;;  %v1371_v50 = vld [vmem:[#allocation7 + $0x60] sm:$0xff]  ;;  %v1353_v52 = vld [vmem:[%s1763_s3 + $0x50] sm:$0xff]  ;;  %v1362_v53 = vld [vmem:[#allocation7 + $0x18] sm:$0xff] }
  0x30   :  { %339 = vmatpush.bf16.msra.mxu2 %v1017_v22  ;;  %352 = vmatpush.bf16.msra.mxu3 %v1021_v23  ;;  %v1370_v54 = vld [vmem:[#allocation7 + $0x58] sm:$0xff]  ;;  %v1344_v55 = vld [vmem:[%s1763_s3 + $0x8] sm:$0xff]  ;;  %v1361_v57 = vld [vmem:[#allocation7 + $0x10] sm:$0xff] }
  0x31   :  { %v1352_v56 = vld [vmem:[%s1763_s3 + $0x48] sm:$0xff]  ;;  %v1369_v58 = vld [vmem:[#allocation7 + $0x50] sm:$0xff]  ;;  %v1343_v59 = vld [vmem:[%s1763_s3] sm:$0xff] }
  0x32   :  { %314 = vmatpush.bf16.msra.mxu0 %v993_v28  ;;  %v1351_v60 = vld [vmem:[%s1763_s3 + $0x40] sm:$0xff]  ;;  %v1360_v62 = vld [vmem:[#allocation7 + $0x8] sm:$0xff]  ;;  %v1359_v1 = vld [vmem:[#allocation7] sm:$0xff] }
  0x33   :  { %327 = vmatpush.bf16.msra.mxu1 %v997_v29  ;;  %v137_v61 = vld [vmem:[#allocation6] sm:$0xf]  ;;  %v1368_v63 = vld [vmem:[#allocation7 + $0x48] sm:$0xff]  ;;  %v1367_v2 = vld [vmem:[#allocation7 + $0x40] sm:$0xff] }
  0x34   :  { %340 = vmatpush.bf16.msra.mxu2 %v1001_v30  ;;  %353 = vmatpush.bf16.msra.mxu3 %v1005_v31  ;;  %v139_v0 = vperm.slane %v137_v61, 0  ;;  %v140_v3 = vperm.slane %v137_v61, 1  ;;  %v141_v10 = vperm.slane %v137_v61, 2  ;;  %v142_v13 = vperm.slane %v137_v61, 3 }
  0x35   :  { %315 = vmatmul.bf16.vlgmr.msra.gmra.mxu0 %v1624_v34 }
  0x36   :  { %536 = vmatpush.bf16.msrb.mxu0 %v1350_v32  ;;  %328 = vmatmul.bf16.vlgmr.msra.gmra.mxu1 %v1624_v34 }
  0x37   :  { %549 = vmatpush.bf16.msrb.mxu1 %v1358_v33  ;;  %341 = vmatmul.bf16.vlgmr.msra.gmra.mxu2 %v1624_v34 }
  0x38   :  { %354 = vmatmul.bf16.vlgmr.msra.gmra.mxu3 %v1624_v34  ;;  %742 = vmatpush.bf16.msrb.mxu2 %v1366_v37 }
  0x39   :  { %755 = vmatpush.bf16.msrb.mxu3 %v1374_v38 }
  0x3a   :  { %537 = vmatpush.bf16.msrb.mxu0 %v1349_v35 }
  0x3b   :  { %550 = vmatpush.bf16.msrb.mxu1 %v1357_v36 }
  0x3c   :  { %743 = vmatpush.bf16.msrb.mxu2 %v1365_v41 }
  0x3d   :  { %756 = vmatpush.bf16.msrb.mxu3 %v1373_v42 }
  0x3e   :  { %538 = vmatpush.bf16.msrb.mxu0 %v1348_v39 }
  0x3f   :  { %551 = vmatpush.bf16.msrb.mxu1 %v1356_v40 }
  0x40   :  { %744 = vmatpush.bf16.msrb.mxu2 %v1364_v45 }
  0x41   :  { %757 = vmatpush.bf16.msrb.mxu3 %v1372_v46 }
  0x42   :  { %539 = vmatpush.bf16.msrb.mxu0 %v1347_v43 }
  0x43   :  { %552 = vmatpush.bf16.msrb.mxu1 %v1355_v44 }
  0x44   :  { %745 = vmatpush.bf16.msrb.mxu2 %v1363_v49 }
  0x45   :  { %758 = vmatpush.bf16.msrb.mxu3 %v1371_v50 }
  0x46   :  { %540 = vmatpush.bf16.msrb.mxu0 %v1346_v47 }
  0x47   :  { %553 = vmatpush.bf16.msrb.mxu1 %v1354_v48 }
  0x48   :  { %746 = vmatpush.bf16.msrb.mxu2 %v1362_v53 }
  0x49   :  { %759 = vmatpush.bf16.msrb.mxu3 %v1370_v54 }
  0x4a   :  { %541 = vmatpush.bf16.msrb.mxu0 %v1345_v51 }
  0x4b   :  { %554 = vmatpush.bf16.msrb.mxu1 %v1353_v52 }
  0x4c   :  { %747 = vmatpush.bf16.msrb.mxu2 %v1361_v57 }
  0x4d   :  { %760 = vmatpush.bf16.msrb.mxu3 %v1369_v58 }
  0x4e   :  { %542 = vmatpush.bf16.msrb.mxu0 %v1344_v55 }
  0x4f   :  { %555 = vmatpush.bf16.msrb.mxu1 %v1352_v56 }
  0x50   :  { %748 = vmatpush.bf16.msrb.mxu2 %v1360_v62 }
  0x51   :  { %761 = vmatpush.bf16.msrb.mxu3 %v1368_v63 }
  0x52   :  { %543 = vmatpush.bf16.msrb.mxu0 %v1343_v59 }
  0x53   :  { %556 = vmatpush.bf16.msrb.mxu1 %v1351_v60 }
  0x54   :  { %749 = vmatpush.bf16.msrb.mxu2 %v1359_v1  ;;  %v1400_v1 = vld [vmem:[%s1764_s4] ss:$0 sm:$0xff] }
  0x55   :  { %762 = vmatpush.bf16.msrb.mxu3 %v1367_v2 }
  0xb2   :  { %v316_v4 = vpop.f32.mrf.mxu0 }
  0xb3   :  { %v317_v5 = vadd.f32 %v316_v4, %v139_v0  ;;  %v329_v6 = vpop.f32.mrf.mxu1 }
  0xb4   :  { %v330_v7 = vadd.f32 %v329_v6, %v140_v3 }
  0xb5   :  { %v363_v8 = vmul.f32 %v317_v5, %v317_v5  ;;  %v359_v11 = vmul.f32 0.7978846, %v317_v5  ;;  %v379_v41 = vmul.f32 0.5, %v317_v5  ;;  %v104_v5 = vunpack.c.l.bf16 %v1624_v34 }
  0xb6   :  { %v364_v9 = vmul.f32 %v330_v7, %v330_v7  ;;  %v360_v14 = vmul.f32 0.7978846, %v330_v7  ;;  %v380_v43 = vmul.f32 0.5, %v330_v7 }
  0xb7   :  { %v367_v12 = vmul.f32 0.044715, %v363_v8 }
  0xb8   :  { %v368_v15 = vmul.f32 0.044715, %v364_v9 }
  0xb9   :  { %v371_v16 = vadd.f32 1.0, %v367_v12 }
  0xba   :  { %v342_v17 = vpop.f32.mrf.mxu2  ;;  %v372_v18 = vadd.f32 1.0, %v368_v15  ;;  %v318_v21 = vpop.f32.mrf.mxu0 }
  0xbb   :  { %v343_v19 = vadd.f32 %v342_v17, %v141_v10  ;;  %v355_v20 = vpop.f32.mrf.mxu3  ;;  %v375_v22 = vmul.f32 %v371_v16, %v359_v11  ;;  %v331_v24 = vpop.f32.mrf.mxu1  ;;  %v1401_v10 = vld [vmem:[%s1768_s8] ss:$0 sm:$0xff]  ;;  %v1381_v21 = vld [vmem:[%s1771_s11 + $0x30] sm:$0xff] }
  0xbc   :  { %v356_v23 = vadd.f32 %v355_v20, %v142_v13  ;;  %v376_v25 = vmul.f32 %v372_v18, %v360_v14  ;;  %v1382_v20 = vld [vmem:[%s1771_s11 + $0x38] sm:$0xff] }
  0xbd   :  { %v365_v26 = vmul.f32 %v343_v19, %v343_v19  ;;  %1407 = vtanh.f32 %v375_v22  ;;  %v361_v30 = vmul.f32 0.7978846, %v343_v19  ;;  %v381_v50 = vmul.f32 0.5, %v343_v19  ;;  %934 = vmatpush.bf16.msra.mxu0 %v1382_v20 }
  0xbe   :  { %v366_v27 = vmul.f32 %v356_v23, %v356_v23  ;;  %1409 = vtanh.f32 %v376_v25  ;;  %v362_v32 = vmul.f32 0.7978846, %v356_v23  ;;  %v382_v54 = vmul.f32 0.5, %v356_v23  ;;  %v1380_v23 = vld [vmem:[%s1771_s11 + $0x28] sm:$0xff]  ;;  %v1379_v25 = vld [vmem:[%s1771_s11 + $0x20] sm:$0xff] }
  0xbf   :  { %v369_v28 = vmul.f32 0.044715, %v365_v26  ;;  %v1535_v19 = vmov 128.0   ;;  %v1390_v26 = vld [vmem:[%s1771_s11 + $0x78] sm:$0xff] }
  0xc0   :  { %v370_v29 = vmul.f32 0.044715, %v366_v27  ;;  %947 = vmatpush.bf16.msra.mxu1 %v1390_v26 }
  0xc1   :  { %v373_v31 = vadd.f32 1.0, %v369_v28  ;;  %935 = vmatpush.bf16.msra.mxu0 %v1381_v21  ;;  %v1378_v28 = vld [vmem:[%s1771_s11 + $0x18] sm:$0xff] }
  0xc2   :  { %v374_v33 = vadd.f32 1.0, %v370_v29  ;;  %v344_v35 = vpop.f32.mrf.mxu2  ;;  %v1389_v29 = vld [vmem:[%s1771_s11 + $0x70] sm:$0xff] }
  0xc3   :  { %v377_v36 = vmul.f32 %v373_v31, %v361_v30  ;;  %v357_v37 = vpop.f32.mrf.mxu3  ;;  %v1408_v38 = vpop.eup %1407  ;;  %v1377_v31 = vld [vmem:[%s1771_s11 + $0x10] sm:$0xff] }
  0xc4   :  { %v378_v39 = vmul.f32 %v374_v33, %v362_v32  ;;  %v1410_v40 = vpop.eup %1409  ;;  %v387_v42 = vadd.f32 1.0, %v1408_v38  ;;  %948 = vmatpush.bf16.msra.mxu1 %v1389_v29  ;;  %v1388_v32 = vld [vmem:[%s1771_s11 + $0x68] sm:$0xff]  ;;  %v1387_v37 = vld [vmem:[%s1771_s11 + $0x60] sm:$0xff] }
  0xc5   :  { %1411 = vtanh.f32 %v377_v36  ;;  %v388_v44 = vadd.f32 1.0, %v1410_v40  ;;  %936 = vmatpush.bf16.msra.mxu0 %v1380_v23  ;;  %v1376_v36 = vld [vmem:[%s1771_s11 + $0x8] sm:$0xff]  ;;  %v1375_v40 = vld [vmem:[%s1771_s11] sm:$0xff] }
  0xc6   :  { %1413 = vtanh.f32 %v378_v39  ;;  %v391_v45 = vmul.f32 %v387_v42, %v379_v41  ;;  %v1386_v41 = vld [vmem:[%s1771_s11 + $0x58] sm:$0xff] }
  0xc7   :  { %v392_v46 = vmul.f32 %v388_v44, %v380_v43  ;;  %1415 = vrcp.f32 %v1535_v19 }
  0xc8   :  { %949 = vmatpush.bf16.msra.mxu1 %v1388_v32 }
  0xc9   :  { %v395_v47 = vpack.c.bf16 %v392_v46, %v391_v45  ;;  %937 = vmatpush.bf16.msra.mxu0 %v1379_v25  ;;  %v1385_v45 = vld [vmem:[%s1771_s11 + $0x50] sm:$0xff] }
  0xcb   :  { %v1412_v48 = vpop.eup %1411  ;;  %v434_v52 = vunpack.c.l.b16 %v395_v47  ;;  %v435_v53 = vunpack.c.h.b16 %v395_v47 }
  0xcc   :  { %v1414_v49 = vpop.eup %1413  ;;  %v389_v51 = vadd.f32 1.0, %v1412_v48  ;;  %950 = vmatpush.bf16.msra.mxu1 %v1387_v37 }
  0xcd   :  { %v390_v55 = vadd.f32 1.0, %v1414_v49  ;;  %v436_v57 = vpack.c.b16 %v434_v52, %v434_v52  ;;  %v437_v58 = vpack.c.b16 %v435_v53, %v435_v53  ;;  %v1416_v22 = vpop.eup %1415  ;;  %938 = vmatpush.bf16.msra.mxu0 %v1378_v28  ;;  %v1384_v49 = vld [vmem:[%s1771_s11 + $0x48] sm:$0xff] }
  0xce   :  { %v393_v56 = vmul.f32 %v389_v51, %v381_v50  ;;  %v566_v24 = vmul.f32 128.0, %v1416_v22  ;;  %vm570_vm0 = vweird.f32 %v1416_v22  ;;  %v1383_v50 = vld [vmem:[%s1771_s11 + $0x40] sm:$0xff] }
  0xcf   :  { %v394_v59 = vmul.f32 %v390_v55, %v382_v54  ;;  %544 = vmatmul.bf16.vlgmr.msrb.gmra.mxu0 %v436_v57  ;;  %557 = vmatmul.bf16.vlgmr.msrb.gmra.mxu1 %v437_v58 }
  0xd0   :  { %v567_v27 = vsub.f32 1.0, %v566_v24  ;;  %951 = vmatpush.bf16.msra.mxu1 %v1386_v41 }
  0xd1   :  { %v396_v60 = vpack.c.bf16 %v394_v59, %v393_v56  ;;  %939 = vmatpush.bf16.msra.mxu0 %v1377_v31 }
  0xd2   :  { %v568_v30 = vmul.f32 %v1416_v22, %v567_v27 }
  0xd3   :  { %v640_v61 = vunpack.c.l.b16 %v396_v60  ;;  %v641_v62 = vunpack.c.h.b16 %v396_v60 }
  0xd4   :  { %v569_v33 = vadd.f32 %v1416_v22, %v568_v30  ;;  %952 = vmatpush.bf16.msra.mxu1 %v1385_v45 }
  0xd5   :  { %v642_v63 = vpack.c.b16 %v640_v61, %v640_v61  ;;  %v643_v0 = vpack.c.b16 %v641_v62, %v641_v62  ;;  %940 = vmatpush.bf16.msra.mxu0 %v1376_v36 }
  0xd6   :  { %v571_v38 = vsel %vm570_vm0, %v1416_v22, %v569_v33 }
  0xd7   :  { %750 = vmatmul.bf16.vlgmr.msrb.gmra.mxu2 %v642_v63  ;;  %763 = vmatmul.bf16.vlgmr.msrb.gmra.mxu3 %v643_v0  ;;  %v1402_v0 = vld [vmem:[%s1765_s5] ss:$0 sm:$0xff] }
  0xd8   :  { %953 = vmatpush.bf16.msra.mxu1 %v1384_v49 }
  0xd9   :  { %941 = vmatpush.bf16.msra.mxu0 %v1375_v40 }
  0xdc   :  { %954 = vmatpush.bf16.msra.mxu1 %v1383_v50 }
 0x14c   :  { %v545_v2 = vpop.f32.mrf.mxu0  ;;  %v558_v3 = vpop.f32.mrf.mxu1 }
 0x14d   :  { %v546_v4 = vadd.f32 %v1400_v1, %v545_v2 }
 0x14f   :  { %v559_v6 = vadd.f32 %v558_v3, %v546_v4  ;;  %v1403_v3 = vld [vmem:[%s1766_s6] ss:$0 sm:$0xff] }
 0x151   :  { %v1676_v7 = vadd.f32 %v559_v6, %v104_v5 }
 0x153   :  { %563 = vadd.xlane.f32.xlu0 %v1676_v7  ;;  %v573_v13 = vmul.f32 %v1676_v7, %v1676_v7 }
 0x154   :  { %v547_v8 = vpop.f32.mrf.mxu0  ;;  %v560_v9 = vpop.f32.mrf.mxu1 }
 0x15a   :  { %v751_v11 = vpop.f32.mrf.mxu2  ;;  %v764_v12 = vpop.f32.mrf.mxu3 }
 0x15b   :  { %v752_v14 = vadd.f32 %v1401_v10, %v751_v11  ;;  %574 = vadd.xlane.f32.xlu0 %v573_v13 }
 0x15d   :  { %v765_v15 = vadd.f32 %v764_v12, %v752_v14  ;;  %v1404_v14 = vld [vmem:[%s1769_s9] ss:$0 sm:$0xff] }
 0x15f   :  { %v1684_v34 = vadd.f32 %v765_v15, %v104_v5 }
 0x161   :  { %769 = vadd.xlane.f32.xlu1 %v1684_v34  ;;  %v772_v18 = vmul.f32 %v1684_v34, %v1684_v34 }
 0x162   :  { %v753_v16 = vpop.f32.mrf.mxu2  ;;  %v766_v17 = vpop.f32.mrf.mxu3 }
 0x163   :  { %v1405_v17 = vld [vmem:[%s1770_s10] ss:$0 sm:$0xff] }
 0x169   :  { %773 = vadd.xlane.f32.xlu1 %v772_v18 }
 0x1c6   :  { %v564_v35 = vpop.xlane.xlu0 %563 }
 0x1c7   :  { %v572_v39 = vmul.f32 %v571_v38, %v564_v35 }
 0x1c9   :  { %v577_v43 = vmul.f32 %v572_v39, %v572_v39  ;;  %v579_v63 = vsub.f32 %v1676_v7, %v572_v39 }
 0x1ce   :  { %v575_v42 = vpop.xlane.xlu0 %574 }
 0x1cf   :  { %v576_v44 = vmul.f32 %v575_v42, %v571_v38 }
 0x1d1   :  { %v578_v46 = vsub.f32 %v576_v44, %v577_v43 }
 0x1d3   :  { %v580_v47 = vadd.f32 1e-05, %v578_v46 }
 0x1d4   :  { %v770_v48 = vpop.xlane.xlu1 %769 }
 0x1d5   :  { %1417 = vrsqrt.f32 %v580_v47  ;;  %v771_v51 = vmul.f32 %v770_v48, %v571_v38  ;;  %vm587_vm2 = vweird.f32 %v580_v47 }
 0x1d7   :  { %v776_v55 = vmul.f32 %v771_v51, %v771_v51  ;;  %v778_v13 = vsub.f32 %v1684_v34, %v771_v51  ;;  %v1406_v34 = vld [vmem:[%s1772_s12] ss:$0 sm:$0xff] }
 0x1db   :  { %v1418_v52 = vpop.eup %1417 }
 0x1dc   :  { %v774_v53 = vpop.xlane.xlu1 %773  ;;  %v582_v54 = vmul.f32 %v1418_v52, %v580_v47  ;;  %vm588_vm1 = vweird.f32 %v1418_v52 }
 0x1dd   :  { %v775_v56 = vmul.f32 %v774_v53, %v571_v38  ;;  %vm589_vm3 = vmor %vm587_vm2, %vm588_vm1 }
 0x1de   :  { %v583_v57 = vmul.f32 %v1418_v52, %v582_v54 }
 0x1df   :  { %v777_v58 = vsub.f32 %v775_v56, %v776_v55 }
 0x1e0   :  { %v584_v59 = vmul.f32 0.5, %v583_v57 }
 0x1e1   :  { %v779_v60 = vadd.f32 1e-05, %v777_v58 }
 0x1e2   :  { %v585_v61 = vsub.f32 1.5, %v584_v59 }
 0x1e3   :  { %1419 = vrsqrt.f32 %v779_v60  ;;  %vm786_vm5 = vweird.f32 %v779_v60 }
 0x1e4   :  { %v586_v62 = vmul.f32 %v1418_v52, %v585_v61 }
 0x1e6   :  { %v590_v1 = vsel %vm589_vm3, %v1418_v52, %v586_v62 }
 0x1e7   :  { %v591_v2 = vmul.f32 %v590_v1, %v579_v63 }
 0x1e9   :  { %v1420_v4 = vpop.eup %1419  ;;  %v596_v6 = vmul.f32 %v1402_v0, %v591_v2 }
 0x1ea   :  { %v781_v5 = vmul.f32 %v1420_v4, %v779_v60  ;;  %vm787_vm4 = vweird.f32 %v1420_v4 }
 0x1eb   :  { %v601_v9 = vadd.f32 %v1403_v3, %v596_v6  ;;  %vm788_vm6 = vmor %vm786_vm5, %vm787_vm4 }
 0x1ec   :  { %v782_v8 = vmul.f32 %v1420_v4, %v781_v5 }
 0x1ed   :  { %v602_v11 = vpack.c.bf16 %v601_v9, %v601_v9 }
 0x1ee   :  { %v783_v10 = vmul.f32 0.5, %v782_v8 }
 0x1ef   :  { %942 = vmatmul.bf16.vlgmr.msra.gmra.mxu0 %v602_v11 }
 0x1f0   :  { %v784_v12 = vsub.f32 1.5, %v783_v10 }
 0x1f2   :  { %v785_v7 = vmul.f32 %v1420_v4, %v784_v12 }
 0x1f4   :  { %v789_v15 = vsel %vm788_vm6, %v1420_v4, %v785_v7 }
 0x1f5   :  { %v790_v16 = vmul.f32 %v789_v15, %v778_v13 }
 0x1f7   :  { %v795_v18 = vmul.f32 %v1404_v14, %v790_v16 }
 0x1f9   :  { %v800_v19 = vadd.f32 %v1405_v17, %v795_v18 }
 0x1fb   :  { %v801_v20 = vpack.c.bf16 %v800_v19, %v800_v19 }
 0x1fd   :  { %955 = vmatmul.bf16.vlgmr.msra.gmra.mxu1 %v801_v20 }
 0x26c   :  { %v943_v21 = vpop.f32.mrf.mxu0 }
 0x26d   :  { %v944_v23 = vadd.f32 %v1406_v34, %v943_v21 }
 0x274   :  { %v945_v22 = vpop.f32.mrf.mxu0 }
 0x27a   :  { %v956_v24 = vpop.f32.mrf.mxu1 }
 0x27b   :  { %v957_v25 = vadd.f32 %v956_v24, %v944_v23 }
 0x27d   :  { %v1310_v26 = vmul.f32 -1.442695, %v957_v25 }
 0x27f   :  { %1421 = vpow2.f32 %v1310_v26 }
 0x282   :  { %v958_v27 = vpop.f32.mrf.mxu1 }
 0x285   :  { %v1422_v28 = vpop.eup %1421 }
 0x286   :  { %v963_v29 = vadd.f32 1.0, %v1422_v28 }
 0x288   :  { %1423 = vrcp.f32 %v963_v29  ;;  %v975_v33 = vand.u32 2147483648, %v963_v29  ;;  %v973_v36 = vand.u32 2147483647, %v963_v29  ;;  %vm969_vm8 = vweird.f32 %v963_v29 }
 0x28a   :  { %v976_v38 = vor.u32 1.1754944e-38, %v975_v33  ;;  %vm974_vm11 = vcmp.eq.f32.partialorder %v973_v36, 8.507059e+37 }
 0x28e   :  { %v1424_v30 = vpop.eup %1423 }
 0x28f   :  { %v965_v31 = vmul.f32 %v1424_v30, %v963_v29  ;;  %vm970_vm7 = vweird.f32 %v1424_v30 }
 0x290   :  { %vm971_vm9 = vmor %vm969_vm8, %vm970_vm7 }
 0x291   :  { %v966_v32 = vsub.f32 1.0, %v965_v31 }
 0x293   :  { %v967_v35 = vmul.f32 %v1424_v30, %v966_v32 }
 0x295   :  { %v968_v37 = vadd.f32 %v1424_v30, %v967_v35 }
 0x297   :  { %v972_v39 = vsel %vm971_vm9, %v1424_v30, %v968_v37 }
 0x298   :  { %v977_v40 = vsel %vm974_vm11, %v976_v38, %v972_v39 }
 0x299   :  { %980 = vst.msk [vmem:[%s1773_s13] sm:$0xff] %vm979_vm10, %v977_v40 }
 0x29a   :  { %982 = vst.msk [vmem:[%s1773_s13] sm:$0xff] %vm981_vm12, %v957_v25 }
 0x29b   :  { %987 = vsyncpa [#allocation3], 1 }
 0x29c   :  { %988 = vsyncpa [#allocation5], 1 }
 0x29d   :  { %989 = vsyncpa [#allocation8], 1 }

// kernel: tpu_custom_call.1
= control target key start
LH: loop header
LB: loop body
LE: loop exit
PB: predicated region body
PF: predicated region fallthrough
CT: control target
= control target key end

     0   :  { %18 = vsyncpa [#allocation3], 0  ;;  %s1760_s0 = inlined_call_operand.hbm [shape: bf16[8,128], index: 0, kind: input, shape index: {}]   ;;  %s1761_s1 = inlined_call_operand.hbm [shape: bf16[128,512], index: 1, kind: input, shape index: {}]   ;;  %s1762_s2 = inlined_call_operand.hbm [shape: f32[1,512], index: 2, kind: input, shape index: {}]   ;;  %s1763_s3 = inlined_call_operand.vmem [shape: bf16[256,128], index: 3, kind: input, shape index: {}]   ;;  %s1764_s4 = inlined_call_operand.vmem [shape: f32[1,128], index: 4, kind: input, shape index: {}]   ;;  %s1765_s5 = inlined_call_operand.vmem [shape: f32[1,128], index: 5, kind: input, shape index: {}]   ;;  %s1766_s6 = inlined_call_operand.vmem [shape: f32[1,128], index: 6, kind: input, shape index: {}]   ;;  %s1767_s7 = inlined_call_operand.hbm [shape: bf16[256,128], index: 7, kind: input, shape index: {}]   ;;  %s1768_s8 = inlined_call_operand.vmem [shape: f32[1,128], index: 8, kind: input, shape index: {}]   ;;  %s1769_s9 = inlined_call_operand.vmem [shape: f32[1,128], index: 9, kind: input, shape index: {}]   ;;  %s1770_s10 = inlined_call_operand.vmem [shape: f32[1,128], index: 10, kind: input, shape index: {}]   ;;  %s1771_s11 = inlined_call_operand.vmem [shape: bf16[256,2], index: 11, kind: input, shape index: {}]   ;;  %s1772_s12 = inlined_call_operand.vmem [shape: f32[1,2], index: 12, kind: input, shape index: {}]   ;;  %s1773_s13 = inlined_call_operand.vmem [shape: f32[8,2], index: 13, kind: output, shape index: {}]  }
   0x1   :  { %19 = vsyncpa [#allocation5], 0  ;;  %s36_s27 = sshll.u32 %s1761_s1, 4  ;;  %s37_s27 = int_to_ptr.hbm [resolvable:$true] %s36_s27 }
   0x2   :  { %20 = vsyncpa [#allocation8], 0  ;;  %s1527_s28 = smov [#allocation4]   ;;  %s26_s15 = sshll.u32 %s1760_s0, 4  ;;  %s27_s15 = int_to_ptr.hbm [resolvable:$true] %s26_s15 }
   0x3   :  { %s38_s29 = sshll.u32 %s1527_s28, 4  ;;  %s1528_s16 = smov 256   ;;  %s39_s29 = int_to_ptr.vmem [resolvable:$true] %s38_s29 }
   0x4   :  { %s1529_s17 = smov 16   ;;  %s1530_s18 = smov [#allocation2]  }
   0x5   :  { %44 = dma.hbm_to_vmem [thread:$0]  %s37_s27, 4096, %s39_s29, [#allocation5], %s1528_s16, %s1528_s16, %s1529_s17  }
   0x6   :  { %s28_s19 = sshll.u32 %s1530_s18, 4  ;;  %s50_s22 = sshll.u32 %s1762_s2, 4  ;;  %s29_s19 = int_to_ptr.vmem [resolvable:$true] %s28_s19  ;;  %s51_s22 = int_to_ptr.hbm [resolvable:$true] %s50_s22 }
   0x7   :  { %31 = dma.hbm_to_vmem [thread:$0]  %s27_s15, 64, %s29_s19, [#allocation3]  }
   0x8   :  { %s68_s24 = sshll.u32 %s1767_s7, 4  ;;  %s1531_s25 = smov [#allocation6]   ;;  %s69_s24 = int_to_ptr.hbm [resolvable:$true] %s68_s24 }
   0x9   :  { %s52_s26 = sshll.u32 %s1531_s25, 4  ;;  %s1532_s0 = smov [#allocation7]   ;;  %s53_s26 = int_to_ptr.vmem [resolvable:$true] %s52_s26 }
   0xa   :  { %55 = dma.hbm_to_vmem [thread:$0]  %s51_s22, 64, %s53_s26, [#allocation5]  }
   0xb   :  { %s70_s27 = sshll.u32 %s1532_s0, 4  ;;  %s1533_s28 = smov 64   ;;  %s71_s27 = int_to_ptr.vmem [resolvable:$true] %s70_s27 }
   0xc   :  { %s1534_s29 = smov 4  }
   0xd   :  { %76 = dma.hbm_to_vmem [thread:$0]  %s69_s24, 2048, %s71_s27, [#allocation8], %s1533_s28, %s1533_s28, %s1534_s29  }
   0xe   :  { %1521 = dma.done.wait [#allocation3], 64  }
   0xf   :  { %1522 = vsyncadd [#allocation3], 4294967232 }
  0x10   :  { %1523 = dma.done.wait [#allocation5], 4160  }
  0x11   :  { %1524 = vsyncadd [#allocation5], 4294963136 }
  0x12   :  { %1525 = dma.done.wait [#allocation8], 2048  }
  0x13   :  { %1526 = vsyncadd [#allocation8], 4294965248  ;;  %v1104_v0 = vld [vmem:[#allocation4 + $0xe0] sm:$0xf]  ;;  %v1341_v1 = vld [vmem:[#allocation4 + $0xec] sm:$0xf0] }
  0x14   :  { %v1339_v2 = vld [vmem:[#allocation4 + $0xe4] sm:$0xf]  ;;  %v1105_v3 = vor.u32 %v1341_v1, %v1104_v0  ;;  %v1106_v4 = vld [vmem:[#allocation4 + $0xf0] sm:$0xf0]  ;;  %v1112_v5 = vld [vmem:[#allocation4 + $0xe8] sm:$0xf] }
  0x15   :  { %v1342_v6 = vld [vmem:[#allocation4 + $0xf4] sm:$0xf0]  ;;  %v1109_v7 = vor.u32 %v1339_v2, %v1106_v4  ;;  %v1340_v9 = vld [vmem:[#allocation4 + $0xec] sm:$0xf]  ;;  %v1114_v10 = vld [vmem:[#allocation4 + $0xf8] sm:$0xf0] }
  0x16   :  { %v1113_v8 = vor.u32 %v1342_v6, %v1112_v5  ;;  %v1088_v11 = vld [vmem:[#allocation4 + $0xc0] sm:$0xf]  ;;  %307 = vmatpush.bf16.msra.mxu0 %v1105_v3  ;;  %v1117_v12 = vor.u32 %v1340_v9, %v1114_v10  ;;  %v1337_v13 = vld [vmem:[#allocation4 + $0xcc] sm:$0xf0]  ;;  %v1335_v14 = vld [vmem:[#allocation4 + $0xc4] sm:$0xf] }
  0x17   :  { %v1090_v15 = vld [vmem:[#allocation4 + $0xd0] sm:$0xf0]  ;;  %320 = vmatpush.bf16.msra.mxu1 %v1109_v7  ;;  %v1089_v16 = vor.u32 %v1337_v13, %v1088_v11  ;;  %v1096_v18 = vld [vmem:[#allocation4 + $0xc8] sm:$0xf]  ;;  %v1338_v19 = vld [vmem:[#allocation4 + $0xd4] sm:$0xf0] }
  0x18   :  { %333 = vmatpush.bf16.msra.mxu2 %v1113_v8  ;;  %v1093_v17 = vor.u32 %v1335_v14, %v1090_v15  ;;  %v1336_v20 = vld [vmem:[#allocation4 + $0xcc] sm:$0xf]  ;;  %346 = vmatpush.bf16.msra.mxu3 %v1117_v12  ;;  %v1097_v21 = vor.u32 %v1338_v19, %v1096_v18  ;;  %v1098_v22 = vld [vmem:[#allocation4 + $0xd8] sm:$0xf0]  ;;  %v1072_v23 = vld [vmem:[#allocation4 + $0xa0] sm:$0xf] }
  0x19   :  { %v1333_v24 = vld [vmem:[#allocation4 + $0xac] sm:$0xf0]  ;;  %v1101_v25 = vor.u32 %v1336_v20, %v1098_v22  ;;  %v1331_v26 = vld [vmem:[#allocation4 + $0xa4] sm:$0xf]  ;;  %v1074_v27 = vld [vmem:[#allocation4 + $0xb0] sm:$0xf0] }
  0x1a   :  { %v1080_v28 = vld [vmem:[#allocation4 + $0xa8] sm:$0xf]  ;;  %308 = vmatpush.bf16.msra.mxu0 %v1089_v16  ;;  %v1073_v29 = vor.u32 %v1333_v24, %v1072_v23  ;;  %v1334_v30 = vld [vmem:[#allocation4 + $0xb4] sm:$0xf0]  ;;  %v1332_v31 = vld [vmem:[#allocation4 + $0xac] sm:$0xf]  ;;  %v1077_v33 = vor.u32 %v1331_v26, %v1074_v27 }
  0x1b   :  { %v1082_v32 = vld [vmem:[#allocation4 + $0xb8] sm:$0xf0]  ;;  %321 = vmatpush.bf16.msra.mxu1 %v1093_v17  ;;  %v1081_v34 = vor.u32 %v1334_v30, %v1080_v28  ;;  %v1056_v35 = vld [vmem:[#allocation4 + $0x80] sm:$0xf]  ;;  %v1329_v36 = vld [vmem:[#allocation4 + $0x8c] sm:$0xf0] }
  0x1c   :  { %334 = vmatpush.bf16.msra.mxu2 %v1097_v21  ;;  %v1327_v37 = vld [vmem:[#allocation4 + $0x84] sm:$0xf]  ;;  %347 = vmatpush.bf16.msra.mxu3 %v1101_v25  ;;  %v1085_v38 = vor.u32 %v1332_v31, %v1082_v32  ;;  %v1058_v39 = vld [vmem:[#allocation4 + $0x90] sm:$0xf0]  ;;  %v1064_v40 = vld [vmem:[#allocation4 + $0x88] sm:$0xf]  ;;  %v1057_v44 = vor.u32 %v1329_v36, %v1056_v35 }
  0x1d   :  { %v1330_v41 = vld [vmem:[#allocation4 + $0x94] sm:$0xf0]  ;;  %v1328_v42 = vld [vmem:[#allocation4 + $0x8c] sm:$0xf]  ;;  %v1066_v43 = vld [vmem:[#allocation4 + $0x98] sm:$0xf0]  ;;  %v1061_v45 = vor.u32 %v1327_v37, %v1058_v39 }
  0x1e   :  { %309 = vmatpush.bf16.msra.mxu0 %v1073_v29  ;;  %v1065_v46 = vor.u32 %v1330_v41, %v1064_v40  ;;  %v1040_v47 = vld [vmem:[#allocation4 + $0x60] sm:$0xf]  ;;  %v1325_v48 = vld [vmem:[#allocation4 + $0x6c] sm:$0xf0]  ;;  %v1323_v49 = vld [vmem:[#allocation4 + $0x64] sm:$0xf]  ;;  %v1069_v50 = vor.u32 %v1328_v42, %v1066_v43 }
  0x1f   :  { %322 = vmatpush.bf16.msra.mxu1 %v1077_v33  ;;  %v1042_v51 = vld [vmem:[#allocation4 + $0x70] sm:$0xf0]  ;;  %v1048_v52 = vld [vmem:[#allocation4 + $0x68] sm:$0xf]  ;;  %v1326_v53 = vld [vmem:[#allocation4 + $0x74] sm:$0xf0]  ;;  %v1041_v56 = vor.u32 %v1325_v48, %v1040_v47 }
  0x20   :  { %335 = vmatpush.bf16.msra.mxu2 %v1081_v34  ;;  %348 = vmatpush.bf16.msra.mxu3 %v1085_v38  ;;  %v1324_v54 = vld [vmem:[#allocation4 + $0x6c] sm:$0xf]  ;;  %v1050_v55 = vld [vmem:[#allocation4 + $0x78] sm:$0xf0]  ;;  %v1045_v57 = vor.u32 %v1323_v49, %v1042_v51  ;;  %v1049_v58 = vor.u32 %v1326_v53, %v1048_v52  ;;  %v1024_v59 = vld [vmem:[#allocation4 + $0x40] sm:$0xf] }
  0x21   :  { %v1321_v60 = vld [vmem:[#allocation4 + $0x4c] sm:$0xf0]  ;;  %v1319_v61 = vld [vmem:[#allocation4 + $0x44] sm:$0xf]  ;;  %v1053_v62 = vor.u32 %v1324_v54, %v1050_v55  ;;  %v1026_v63 = vld [vmem:[#allocation4 + $0x50] sm:$0xf0] }
  0x22   :  { %310 = vmatpush.bf16.msra.mxu0 %v1057_v44  ;;  %v1032_v0 = vld [vmem:[#allocation4 + $0x48] sm:$0xf]  ;;  %v1322_v1 = vld [vmem:[#allocation4 + $0x54] sm:$0xf0]  ;;  %v1320_v2 = vld [vmem:[#allocation4 + $0x4c] sm:$0xf]  ;;  %v1025_v4 = vor.u32 %v1321_v60, %v1024_v59  ;;  %v1029_v7 = vor.u32 %v1319_v61, %v1026_v63 }
  0x23   :  { %323 = vmatpush.bf16.msra.mxu1 %v1061_v45  ;;  %v1034_v3 = vld [vmem:[#allocation4 + $0x58] sm:$0xf0]  ;;  %v1008_v5 = vld [vmem:[#allocation4 + $0x20] sm:$0xf]  ;;  %v1317_v6 = vld [vmem:[#allocation4 + $0x2c] sm:$0xf0]  ;;  %v1033_v8 = vor.u32 %v1322_v1, %v1032_v0 }
  0x24   :  { %336 = vmatpush.bf16.msra.mxu2 %v1065_v46  ;;  %349 = vmatpush.bf16.msra.mxu3 %v1069_v50  ;;  %v1315_v9 = vld [vmem:[#allocation4 + $0x24] sm:$0xf]  ;;  %v1010_v10 = vld [vmem:[#allocation4 + $0x30] sm:$0xf0]  ;;  %v1016_v11 = vld [vmem:[#allocation4 + $0x28] sm:$0xf]  ;;  %v1037_v12 = vor.u32 %v1320_v2, %v1034_v3  ;;  %v1009_v18 = vor.u32 %v1317_v6, %v1008_v5 }
  0x25   :  { %v1318_v13 = vld [vmem:[#allocation4 + $0x34] sm:$0xf0]  ;;  %v1316_v14 = vld [vmem:[#allocation4 + $0x2c] sm:$0xf]  ;;  %v1018_v15 = vld [vmem:[#allocation4 + $0x38] sm:$0xf0]  ;;  %v1013_v21 = vor.u32 %v1315_v9, %v1010_v10 }
  0x26   :  { %311 = vmatpush.bf16.msra.mxu0 %v1041_v56  ;;  %v992_v16 = vld [vmem:[#allocation4] sm:$0xf]  ;;  %v1313_v17 = vld [vmem:[#allocation4 + $0xc] sm:$0xf0]  ;;  %v1311_v19 = vld [vmem:[#allocation4 + $0x4] sm:$0xf]  ;;  %v1017_v22 = vor.u32 %v1318_v13, %v1016_v11  ;;  %v1021_v23 = vor.u32 %v1316_v14, %v1018_v15 }
  0x27   :  { %324 = vmatpush.bf16.msra.mxu1 %v1045_v57  ;;  %v994_v20 = vld [vmem:[#allocation4 + $0x10] sm:$0xf0]  ;;  %v1000_v24 = vld [vmem:[#allocation4 + $0x8] sm:$0xf]  ;;  %v1314_v25 = vld [vmem:[#allocation4 + $0x14] sm:$0xf0]  ;;  %v993_v28 = vor.u32 %v1313_v17, %v992_v16 }
  0x28   :  { %337 = vmatpush.bf16.msra.mxu2 %v1049_v58  ;;  %350 = vmatpush.bf16.msra.mxu3 %v1053_v62  ;;  %v1312_v26 = vld [vmem:[#allocation4 + $0xc] sm:$0xf]  ;;  %v1002_v27 = vld [vmem:[#allocation4 + $0x18] sm:$0xf0]  ;;  %v997_v29 = vor.u32 %v1311_v19, %v994_v20  ;;  %v1001_v30 = vor.u32 %v1314_v25, %v1000_v24  ;;  %v1350_v32 = vld [vmem:[%s1763_s3 + $0x38] sm:$0xff]  ;;  %vm979_vm10 = vcmask 7168  }
  0x29   :  { %v1005_v31 = vor.u32 %v1312_v26, %v1002_v27  ;;  %v1358_v33 = vld [vmem:[%s1763_s3 + $0x78] sm:$0xff]  ;;  %v1624_v34 = vld [vmem:[#allocation2] sm:$0xf]  ;;  %v1349_v35 = vld [vmem:[%s1763_s3 + $0x30] sm:$0xff]  ;;  %vm981_vm12 = vcmask 15368  }
  0x2a   :  { %312 = vmatpush.bf16.msra.mxu0 %v1025_v4  ;;  %v1357_v36 = vld [vmem:[%s1763_s3 + $0x70] sm:$0xff]  ;;  %v1366_v37 = vld [vmem:[#allocation7 + $0x38] sm:$0xff]  ;;  %v1348_v39 = vld [vmem:[%s1763_s3 + $0x28] sm:$0xff] }
  0x2b   :  { %325 = vmatpush.bf16.msra.mxu1 %v1029_v7  ;;  %v1374_v38 = vld [vmem:[#allocation7 + $0x78] sm:$0xff]  ;;  %v1356_v40 = vld [vmem:[%s1763_s3 + $0x68] sm:$0xff]  ;;  %v1365_v41 = vld [vmem:[#allocation7 + $0x30] sm:$0xff] }
  0x2c   :  { %338 = vmatpush.bf16.msra.mxu2 %v1033_v8  ;;  %351 = vmatpush.bf16.msra.mxu3 %v1037_v12  ;;  %v1373_v42 = vld [vmem:[#allocation7 + $0x70] sm:$0xff]  ;;  %v1347_v43 = vld [vmem:[%s1763_s3 + $0x20] sm:$0xff]  ;;  %v1364_v45 = vld [vmem:[#allocation7 + $0x28] sm:$0xff] }
  0x2d   :  { %v1355_v44 = vld [vmem:[%s1763_s3 + $0x60] sm:$0xff]  ;;  %v1372_v46 = vld [vmem:[#allocation7 + $0x68] sm:$0xff]  ;;  %v1346_v47 = vld [vmem:[%s1763_s3 + $0x18] sm:$0xff] }
  0x2e   :  { %313 = vmatpush.bf16.msra.mxu0 %v1009_v18  ;;  %v1354_v48 = vld [vmem:[%s1763_s3 + $0x58] sm:$0xff]  ;;  %v1363_v49 = vld [vmem:[#allocation7 + $0x20] sm:$0xff]  ;;  %v1345_v51 = vld [vmem:[%s1763_s3 + $0x10] sm:$0xff] }
  0x2f   :  { %326 = vmatpush.bf16.msra.mxu1 %v1013_v21  ;;  %v1371_v50 = vld [vmem:[#allocation7 + $0x60] sm:$0xff]  ;;  %v1353_v52 = vld [vmem:[%s1763_s3 + $0x50] sm:$0xff]  ;;  %v1362_v53 = vld [vmem:[#allocation7 + $0x18] sm:$0xff] }
  0x30   :  { %339 = vmatpush.bf16.msra.mxu2 %v1017_v22  ;;  %352 = vmatpush.bf16.msra.mxu3 %v1021_v23  ;;  %v1370_v54 = vld [vmem:[#allocation7 + $0x58] sm:$0xff]  ;;  %v1344_v55 = vld [vmem:[%s1763_s3 + $0x8] sm:$0xff]  ;;  %v1361_v57 = vld [vmem:[#allocation7 + $0x10] sm:$0xff] }
  0x31   :  { %v1352_v56 = vld [vmem:[%s1763_s3 + $0x48] sm:$0xff]  ;;  %v1369_v58 = vld [vmem:[#allocation7 + $0x50] sm:$0xff]  ;;  %v1343_v59 = vld [vmem:[%s1763_s3] sm:$0xff] }
  0x32   :  { %314 = vmatpush.bf16.msra.mxu0 %v993_v28  ;;  %v1351_v60 = vld [vmem:[%s1763_s3 + $0x40] sm:$0xff]  ;;  %v1360_v62 = vld [vmem:[#allocation7 + $0x8] sm:$0xff]  ;;  %v1359_v1 = vld [vmem:[#allocation7] sm:$0xff] }
  0x33   :  { %327 = vmatpush.bf16.msra.mxu1 %v997_v29  ;;  %v137_v61 = vld [vmem:[#allocation6] sm:$0xf]  ;;  %v1368_v63 = vld [vmem:[#allocation7 + $0x48] sm:$0xff]  ;;  %v1367_v2 = vld [vmem:[#allocation7 + $0x40] sm:$0xff] }
  0x34   :  { %340 = vmatpush.bf16.msra.mxu2 %v1001_v30  ;;  %353 = vmatpush.bf16.msra.mxu3 %v1005_v31  ;;  %v139_v0 = vperm.slane %v137_v61, 0  ;;  %v140_v3 = vperm.slane %v137_v61, 1  ;;  %v141_v10 = vperm.slane %v137_v61, 2  ;;  %v142_v13 = vperm.slane %v137_v61, 3 }
  0x35   :  { %315 = vmatmul.bf16.vlgmr.msra.gmra.mxu0 %v1624_v34 }
  0x36   :  { %536 = vmatpush.bf16.msrb.mxu0 %v1350_v32  ;;  %328 = vmatmul.bf16.vlgmr.msra.gmra.mxu1 %v1624_v34 }
  0x37   :  { %549 = vmatpush.bf16.msrb.mxu1 %v1358_v33  ;;  %341 = vmatmul.bf16.vlgmr.msra.gmra.mxu2 %v1624_v34 }
  0x38   :  { %354 = vmatmul.bf16.vlgmr.msra.gmra.mxu3 %v1624_v34  ;;  %742 = vmatpush.bf16.msrb.mxu2 %v1366_v37 }
  0x39   :  { %755 = vmatpush.bf16.msrb.mxu3 %v1374_v38 }
  0x3a   :  { %537 = vmatpush.bf16.msrb.mxu0 %v1349_v35 }
  0x3b   :  { %550 = vmatpush.bf16.msrb.mxu1 %v1357_v36 }
  0x3c   :  { %743 = vmatpush.bf16.msrb.mxu2 %v1365_v41 }
  0x3d   :  { %756 = vmatpush.bf16.msrb.mxu3 %v1373_v42 }
  0x3e   :  { %538 = vmatpush.bf16.msrb.mxu0 %v1348_v39 }
  0x3f   :  { %551 = vmatpush.bf16.msrb.mxu1 %v1356_v40 }
  0x40   :  { %744 = vmatpush.bf16.msrb.mxu2 %v1364_v45 }
  0x41   :  { %757 = vmatpush.bf16.msrb.mxu3 %v1372_v46 }
  0x42   :  { %539 = vmatpush.bf16.msrb.mxu0 %v1347_v43 }
  0x43   :  { %552 = vmatpush.bf16.msrb.mxu1 %v1355_v44 }
  0x44   :  { %745 = vmatpush.bf16.msrb.mxu2 %v1363_v49 }
  0x45   :  { %758 = vmatpush.bf16.msrb.mxu3 %v1371_v50 }
  0x46   :  { %540 = vmatpush.bf16.msrb.mxu0 %v1346_v47 }
  0x47   :  { %553 = vmatpush.bf16.msrb.mxu1 %v1354_v48 }
  0x48   :  { %746 = vmatpush.bf16.msrb.mxu2 %v1362_v53 }
  0x49   :  { %759 = vmatpush.bf16.msrb.mxu3 %v1370_v54 }
  0x4a   :  { %541 = vmatpush.bf16.msrb.mxu0 %v1345_v51 }
  0x4b   :  { %554 = vmatpush.bf16.msrb.mxu1 %v1353_v52 }
  0x4c   :  { %747 = vmatpush.bf16.msrb.mxu2 %v1361_v57 }
  0x4d   :  { %760 = vmatpush.bf16.msrb.mxu3 %v1369_v58 }
  0x4e   :  { %542 = vmatpush.bf16.msrb.mxu0 %v1344_v55 }
  0x4f   :  { %555 = vmatpush.bf16.msrb.mxu1 %v1352_v56 }
  0x50   :  { %748 = vmatpush.bf16.msrb.mxu2 %v1360_v62 }
  0x51   :  { %761 = vmatpush.bf16.msrb.mxu3 %v1368_v63 }
  0x52   :  { %543 = vmatpush.bf16.msrb.mxu0 %v1343_v59 }
  0x53   :  { %556 = vmatpush.bf16.msrb.mxu1 %v1351_v60 }
  0x54   :  { %749 = vmatpush.bf16.msrb.mxu2 %v1359_v1  ;;  %v1400_v1 = vld [vmem:[%s1764_s4] ss:$0 sm:$0xff] }
  0x55   :  { %762 = vmatpush.bf16.msrb.mxu3 %v1367_v2 }
  0xb2   :  { %v316_v4 = vpop.f32.mrf.mxu0 }
  0xb3   :  { %v317_v5 = vadd.f32 %v316_v4, %v139_v0  ;;  %v329_v6 = vpop.f32.mrf.mxu1 }
  0xb4   :  { %v330_v7 = vadd.f32 %v329_v6, %v140_v3 }
  0xb5   :  { %v363_v8 = vmul.f32 %v317_v5, %v317_v5  ;;  %v359_v11 = vmul.f32 0.7978846, %v317_v5  ;;  %v379_v41 = vmul.f32 0.5, %v317_v5  ;;  %v104_v5 = vunpack.c.l.bf16 %v1624_v34 }
  0xb6   :  { %v364_v9 = vmul.f32 %v330_v7, %v330_v7  ;;  %v360_v14 = vmul.f32 0.7978846, %v330_v7  ;;  %v380_v43 = vmul.f32 0.5, %v330_v7 }
  0xb7   :  { %v367_v12 = vmul.f32 0.044715, %v363_v8 }
  0xb8   :  { %v368_v15 = vmul.f32 0.044715, %v364_v9 }
  0xb9   :  { %v371_v16 = vadd.f32 1.0, %v367_v12 }
  0xba   :  { %v342_v17 = vpop.f32.mrf.mxu2  ;;  %v372_v18 = vadd.f32 1.0, %v368_v15  ;;  %v318_v21 = vpop.f32.mrf.mxu0 }
  0xbb   :  { %v343_v19 = vadd.f32 %v342_v17, %v141_v10  ;;  %v355_v20 = vpop.f32.mrf.mxu3  ;;  %v375_v22 = vmul.f32 %v371_v16, %v359_v11  ;;  %v331_v24 = vpop.f32.mrf.mxu1  ;;  %v1401_v10 = vld [vmem:[%s1768_s8] ss:$0 sm:$0xff]  ;;  %v1381_v21 = vld [vmem:[%s1771_s11 + $0x30] sm:$0xff] }
  0xbc   :  { %v356_v23 = vadd.f32 %v355_v20, %v142_v13  ;;  %v376_v25 = vmul.f32 %v372_v18, %v360_v14  ;;  %v1382_v20 = vld [vmem:[%s1771_s11 + $0x38] sm:$0xff] }
  0xbd   :  { %v365_v26 = vmul.f32 %v343_v19, %v343_v19  ;;  %1407 = vtanh.f32 %v375_v22  ;;  %v361_v30 = vmul.f32 0.7978846, %v343_v19  ;;  %v381_v50 = vmul.f32 0.5, %v343_v19  ;;  %934 = vmatpush.bf16.msra.mxu0 %v1382_v20 }
  0xbe   :  { %v366_v27 = vmul.f32 %v356_v23, %v356_v23  ;;  %1409 = vtanh.f32 %v376_v25  ;;  %v362_v32 = vmul.f32 0.7978846, %v356_v23  ;;  %v382_v54 = vmul.f32 0.5, %v356_v23  ;;  %v1380_v23 = vld [vmem:[%s1771_s11 + $0x28] sm:$0xff]  ;;  %v1379_v25 = vld [vmem:[%s1771_s11 + $0x20] sm:$0xff] }
  0xbf   :  { %v369_v28 = vmul.f32 0.044715, %v365_v26  ;;  %v1535_v19 = vmov 128.0   ;;  %v1390_v26 = vld [vmem:[%s1771_s11 + $0x78] sm:$0xff] }
  0xc0   :  { %v370_v29 = vmul.f32 0.044715, %v366_v27  ;;  %947 = vmatpush.bf16.msra.mxu1 %v1390_v26 }
  0xc1   :  { %v373_v31 = vadd.f32 1.0, %v369_v28  ;;  %935 = vmatpush.bf16.msra.mxu0 %v1381_v21  ;;  %v1378_v28 = vld [vmem:[%s1771_s11 + $0x18] sm:$0xff] }
  0xc2   :  { %v374_v33 = vadd.f32 1.0, %v370_v29  ;;  %v344_v35 = vpop.f32.mrf.mxu2  ;;  %v1389_v29 = vld [vmem:[%s1771_s11 + $0x70] sm:$0xff] }
  0xc3   :  { %v377_v36 = vmul.f32 %v373_v31, %v361_v30  ;;  %v357_v37 = vpop.f32.mrf.mxu3  ;;  %v1408_v38 = vpop.eup %1407  ;;  %v1377_v31 = vld [vmem:[%s1771_s11 + $0x10] sm:$0xff] }
  0xc4   :  { %v378_v39 = vmul.f32 %v374_v33, %v362_v32  ;;  %v1410_v40 = vpop.eup %1409  ;;  %v387_v42 = vadd.f32 1.0, %v1408_v38  ;;  %948 = vmatpush.bf16.msra.mxu1 %v1389_v29  ;;  %v1388_v32 = vld [vmem:[%s1771_s11 + $0x68] sm:$0xff]  ;;  %v1387_v37 = vld [vmem:[%s1771_s11 + $0x60] sm:$0xff] }
  0xc5   :  { %1411 = vtanh.f32 %v377_v36  ;;  %v388_v44 = vadd.f32 1.0, %v1410_v40  ;;  %936 = vmatpush.bf16.msra.mxu0 %v1380_v23  ;;  %v1376_v36 = vld [vmem:[%s1771_s11 + $0x8] sm:$0xff]  ;;  %v1375_v40 = vld [vmem:[%s1771_s11] sm:$0xff] }
  0xc6   :  { %1413 = vtanh.f32 %v378_v39  ;;  %v391_v45 = vmul.f32 %v387_v42, %v379_v41  ;;  %v1386_v41 = vld [vmem:[%s1771_s11 + $0x58] sm:$0xff] }
  0xc7   :  { %v392_v46 = vmul.f32 %v388_v44, %v380_v43  ;;  %1415 = vrcp.f32 %v1535_v19 }
  0xc8   :  { %949 = vmatpush.bf16.msra.mxu1 %v1388_v32 }
  0xc9   :  { %v395_v47 = vpack.c.bf16 %v392_v46, %v391_v45  ;;  %937 = vmatpush.bf16.msra.mxu0 %v1379_v25  ;;  %v1385_v45 = vld [vmem:[%s1771_s11 + $0x50] sm:$0xff] }
  0xcb   :  { %v1412_v48 = vpop.eup %1411  ;;  %v434_v52 = vunpack.c.l.b16 %v395_v47  ;;  %v435_v53 = vunpack.c.h.b16 %v395_v47 }
  0xcc   :  { %v1414_v49 = vpop.eup %1413  ;;  %v389_v51 = vadd.f32 1.0, %v1412_v48  ;;  %950 = vmatpush.bf16.msra.mxu1 %v1387_v37 }
  0xcd   :  { %v390_v55 = vadd.f32 1.0, %v1414_v49  ;;  %v436_v57 = vpack.c.b16 %v434_v52, %v434_v52  ;;  %v437_v58 = vpack.c.b16 %v435_v53, %v435_v53  ;;  %v1416_v22 = vpop.eup %1415  ;;  %938 = vmatpush.bf16.msra.mxu0 %v1378_v28  ;;  %v1384_v49 = vld [vmem:[%s1771_s11 + $0x48] sm:$0xff] }
  0xce   :  { %v393_v56 = vmul.f32 %v389_v51, %v381_v50  ;;  %v566_v24 = vmul.f32 128.0, %v1416_v22  ;;  %vm570_vm0 = vweird.f32 %v1416_v22  ;;  %v1383_v50 = vld [vmem:[%s1771_s11 + $0x40] sm:$0xff] }
  0xcf   :  { %v394_v59 = vmul.f32 %v390_v55, %v382_v54  ;;  %544 = vmatmul.bf16.vlgmr.msrb.gmra.mxu0 %v436_v57  ;;  %557 = vmatmul.bf16.vlgmr.msrb.gmra.mxu1 %v437_v58 }
  0xd0   :  { %v567_v27 = vsub.f32 1.0, %v566_v24  ;;  %951 = vmatpush.bf16.msra.mxu1 %v1386_v41 }
  0xd1   :  { %v396_v60 = vpack.c.bf16 %v394_v59, %v393_v56  ;;  %939 = vmatpush.bf16.msra.mxu0 %v1377_v31 }
  0xd2   :  { %v568_v30 = vmul.f32 %v1416_v22, %v567_v27 }
  0xd3   :  { %v640_v61 = vunpack.c.l.b16 %v396_v60  ;;  %v641_v62 = vunpack.c.h.b16 %v396_v60 }
  0xd4   :  { %v569_v33 = vadd.f32 %v1416_v22, %v568_v30  ;;  %952 = vmatpush.bf16.msra.mxu1 %v1385_v45 }
  0xd5   :  { %v642_v63 = vpack.c.b16 %v640_v61, %v640_v61  ;;  %v643_v0 = vpack.c.b16 %v641_v62, %v641_v62  ;;  %940 = vmatpush.bf16.msra.mxu0 %v1376_v36 }
  0xd6   :  { %v571_v38 = vsel %vm570_vm0, %v1416_v22, %v569_v33 }
  0xd7   :  { %750 = vmatmul.bf16.vlgmr.msrb.gmra.mxu2 %v642_v63  ;;  %763 = vmatmul.bf16.vlgmr.msrb.gmra.mxu3 %v643_v0  ;;  %v1402_v0 = vld [vmem:[%s1765_s5] ss:$0 sm:$0xff] }
  0xd8   :  { %953 = vmatpush.bf16.msra.mxu1 %v1384_v49 }
  0xd9   :  { %941 = vmatpush.bf16.msra.mxu0 %v1375_v40 }
  0xdc   :  { %954 = vmatpush.bf16.msra.mxu1 %v1383_v50 }
 0x14c   :  { %v545_v2 = vpop.f32.mrf.mxu0  ;;  %v558_v3 = vpop.f32.mrf.mxu1 }
 0x14d   :  { %v546_v4 = vadd.f32 %v1400_v1, %v545_v2 }
 0x14f   :  { %v559_v6 = vadd.f32 %v558_v3, %v546_v4  ;;  %v1403_v3 = vld [vmem:[%s1766_s6] ss:$0 sm:$0xff] }
 0x151   :  { %v1676_v7 = vadd.f32 %v559_v6, %v104_v5 }
 0x153   :  { %563 = vadd.xlane.f32.xlu0 %v1676_v7  ;;  %v573_v13 = vmul.f32 %v1676_v7, %v1676_v7 }
 0x154   :  { %v547_v8 = vpop.f32.mrf.mxu0  ;;  %v560_v9 = vpop.f32.mrf.mxu1 }
 0x15a   :  { %v751_v11 = vpop.f32.mrf.mxu2  ;;  %v764_v12 = vpop.f32.mrf.mxu3 }
 0x15b   :  { %v752_v14 = vadd.f32 %v1401_v10, %v751_v11  ;;  %574 = vadd.xlane.f32.xlu0 %v573_v13 }
 0x15d   :  { %v765_v15 = vadd.f32 %v764_v12, %v752_v14  ;;  %v1404_v14 = vld [vmem:[%s1769_s9] ss:$0 sm:$0xff] }
 0x15f   :  { %v1684_v34 = vadd.f32 %v765_v15, %v104_v5 }
 0x161   :  { %769 = vadd.xlane.f32.xlu1 %v1684_v34  ;;  %v772_v18 = vmul.f32 %v1684_v34, %v1684_v34 }
 0x162   :  { %v753_v16 = vpop.f32.mrf.mxu2  ;;  %v766_v17 = vpop.f32.mrf.mxu3 }
 0x163   :  { %v1405_v17 = vld [vmem:[%s1770_s10] ss:$0 sm:$0xff] }
 0x169   :  { %773 = vadd.xlane.f32.xlu1 %v772_v18 }
 0x1c6   :  { %v564_v35 = vpop.xlane.xlu0 %563 }
 0x1c7   :  { %v572_v39 = vmul.f32 %v571_v38, %v564_v35 }
 0x1c9   :  { %v577_v43 = vmul.f32 %v572_v39, %v572_v39  ;;  %v579_v63 = vsub.f32 %v1676_v7, %v572_v39 }
 0x1ce   :  { %v575_v42 = vpop.xlane.xlu0 %574 }
 0x1cf   :  { %v576_v44 = vmul.f32 %v575_v42, %v571_v38 }
 0x1d1   :  { %v578_v46 = vsub.f32 %v576_v44, %v577_v43 }
 0x1d3   :  { %v580_v47 = vadd.f32 1e-05, %v578_v46 }
 0x1d4   :  { %v770_v48 = vpop.xlane.xlu1 %769 }
 0x1d5   :  { %1417 = vrsqrt.f32 %v580_v47  ;;  %v771_v51 = vmul.f32 %v770_v48, %v571_v38  ;;  %vm587_vm2 = vweird.f32 %v580_v47 }
 0x1d7   :  { %v776_v55 = vmul.f32 %v771_v51, %v771_v51  ;;  %v778_v13 = vsub.f32 %v1684_v34, %v771_v51  ;;  %v1406_v34 = vld [vmem:[%s1772_s12] ss:$0 sm:$0xff] }
 0x1db   :  { %v1418_v52 = vpop.eup %1417 }
 0x1dc   :  { %v774_v53 = vpop.xlane.xlu1 %773  ;;  %v582_v54 = vmul.f32 %v1418_v52, %v580_v47  ;;  %vm588_vm1 = vweird.f32 %v1418_v52 }
 0x1dd   :  { %v775_v56 = vmul.f32 %v774_v53, %v571_v38  ;;  %vm589_vm3 = vmor %vm587_vm2, %vm588_vm1 }
 0x1de   :  { %v583_v57 = vmul.f32 %v1418_v52, %v582_v54 }
 0x1df   :  { %v777_v58 = vsub.f32 %v775_v56, %v776_v55 }
 0x1e0   :  { %v584_v59 = vmul.f32 0.5, %v583_v57 }
 0x1e1   :  { %v779_v60 = vadd.f32 1e-05, %v777_v58 }
 0x1e2   :  { %v585_v61 = vsub.f32 1.5, %v584_v59 }
 0x1e3   :  { %1419 = vrsqrt.f32 %v779_v60  ;;  %vm786_vm5 = vweird.f32 %v779_v60 }
 0x1e4   :  { %v586_v62 = vmul.f32 %v1418_v52, %v585_v61 }
 0x1e6   :  { %v590_v1 = vsel %vm589_vm3, %v1418_v52, %v586_v62 }
 0x1e7   :  { %v591_v2 = vmul.f32 %v590_v1, %v579_v63 }
 0x1e9   :  { %v1420_v4 = vpop.eup %1419  ;;  %v596_v6 = vmul.f32 %v1402_v0, %v591_v2 }
 0x1ea   :  { %v781_v5 = vmul.f32 %v1420_v4, %v779_v60  ;;  %vm787_vm4 = vweird.f32 %v1420_v4 }
 0x1eb   :  { %v601_v9 = vadd.f32 %v1403_v3, %v596_v6  ;;  %vm788_vm6 = vmor %vm786_vm5, %vm787_vm4 }
 0x1ec   :  { %v782_v8 = vmul.f32 %v1420_v4, %v781_v5 }
 0x1ed   :  { %v602_v11 = vpack.c.bf16 %v601_v9, %v601_v9 }
 0x1ee   :  { %v783_v10 = vmul.f32 0.5, %v782_v8 }
 0x1ef   :  { %942 = vmatmul.bf16.vlgmr.msra.gmra.mxu0 %v602_v11 }
 0x1f0   :  { %v784_v12 = vsub.f32 1.5, %v783_v10 }
 0x1f2   :  { %v785_v7 = vmul.f32 %v1420_v4, %v784_v12 }
 0x1f4   :  { %v789_v15 = vsel %vm788_vm6, %v1420_v4, %v785_v7 }
 0x1f5   :  { %v790_v16 = vmul.f32 %v789_v15, %v778_v13 }
 0x1f7   :  { %v795_v18 = vmul.f32 %v1404_v14, %v790_v16 }
 0x1f9   :  { %v800_v19 = vadd.f32 %v1405_v17, %v795_v18 }
 0x1fb   :  { %v801_v20 = vpack.c.bf16 %v800_v19, %v800_v19 }
 0x1fd   :  { %955 = vmatmul.bf16.vlgmr.msra.gmra.mxu1 %v801_v20 }
 0x26c   :  { %v943_v21 = vpop.f32.mrf.mxu0 }
 0x26d   :  { %v944_v23 = vadd.f32 %v1406_v34, %v943_v21 }
 0x274   :  { %v945_v22 = vpop.f32.mrf.mxu0 }
 0x27a   :  { %v956_v24 = vpop.f32.mrf.mxu1 }
 0x27b   :  { %v957_v25 = vadd.f32 %v956_v24, %v944_v23 }
 0x27d   :  { %v1310_v26 = vmul.f32 -1.442695, %v957_v25 }
 0x27f   :  { %1421 = vpow2.f32 %v1310_v26 }
 0x282   :  { %v958_v27 = vpop.f32.mrf.mxu1 }
 0x285   :  { %v1422_v28 = vpop.eup %1421 }
 0x286   :  { %v963_v29 = vadd.f32 1.0, %v1422_v28 }
 0x288   :  { %1423 = vrcp.f32 %v963_v29  ;;  %v975_v33 = vand.u32 2147483648, %v963_v29  ;;  %v973_v36 = vand.u32 2147483647, %v963_v29  ;;  %vm969_vm8 = vweird.f32 %v963_v29 }
 0x28a   :  { %v976_v38 = vor.u32 1.1754944e-38, %v975_v33  ;;  %vm974_vm11 = vcmp.eq.f32.partialorder %v973_v36, 8.507059e+37 }
 0x28e   :  { %v1424_v30 = vpop.eup %1423 }
 0x28f   :  { %v965_v31 = vmul.f32 %v1424_v30, %v963_v29  ;;  %vm970_vm7 = vweird.f32 %v1424_v30 }
 0x290   :  { %vm971_vm9 = vmor %vm969_vm8, %vm970_vm7 }
 0x291   :  { %v966_v32 = vsub.f32 1.0, %v965_v31 }
 0x293   :  { %v967_v35 = vmul.f32 %v1424_v30, %v966_v32 }
 0x295   :  { %v968_v37 = vadd.f32 %v1424_v30, %v967_v35 }
 0x297   :  { %v972_v39 = vsel %vm971_vm9, %v1424_v30, %v968_v37 }
 0x298   :  { %v977_v40 = vsel %vm974_vm11, %v976_v38, %v972_v39 }
 0x299   :  { %980 = vst.msk [vmem:[%s1773_s13] sm:$0xff] %vm979_vm10, %v977_v40 }
 0x29a   :  { %982 = vst.msk [vmem:[%s1773_s13] sm:$0xff] %vm981_vm12, %v957_v25 }
 0x29b   :  { %987 = vsyncpa [#allocation3], 1 }
 0x29c   :  { %988 = vsyncpa [#allocation5], 1 }
 0x29d   :  { %989 = vsyncpa [#allocation8], 1 }

</bundles_post_ra>
